<compile_context>
chip_gen: v6e
topology: v6e:2x2x1
jax: 0.10.0
libtpu: 0.0.40
codegen_flags: <defaults>
</compile_context>

<pallas_src>
import functools

import numpy as np
import jax
import jax.numpy as jnp
from jax.experimental import pallas as pl
from jax.experimental.pallas import tpu as pltpu

# ---- module hyper-parameters (RelativeVolumeMel.__init__ defaults) ----
SAMPLE_RATE = 24000
N_MELS = 80
N_FFT = 512
HOP = 128
N_FREQ = N_FFT // 2 + 1            # 257 one-sided bins
MIN_REL_VOL = -25.0
MAX_REL_VOL = 25.0
MAX_INITIAL_GAIN = 25.0
MIN_ACTIVITY_VOLUME = -25.0
NUM_AGG_BANDS = 4

# packed / lane-padded sizes (DC + Nyquist dropped: mel-fbank rows 0/256 are 0)
N_BINS = N_FREQ - 2                # 255 usable bins (1..255)
HALF = 256                         # lane-padded bin count
RHS_W = 2 * HALF                   # [cos | sin] = 512
N_MELS_PAD = 128                   # 80 -> 128
TILE_M = 512                       # frames per MXU tile (sweep 512-1024)


def db_to_scale(db):
    return 10.0 ** (db / 20.0)


MIN_INIT_SCALE = db_to_scale(-MAX_INITIAL_GAIN)     # clamp for RMS
MIN_ACT_SCALE = db_to_scale(MIN_ACTIVITY_VOLUME)    # clamp inside ref_db
MIN_120_SCALE = db_to_scale(-120.0)                 # clamp inside delta_db


def _round_up(x, m):
    return ((x + m - 1) // m) * m


# ------------------------- constant tables (glue) -------------------------
def _hz_to_mel(f):   # HTK scale (torchaudio MelSpectrogram default)
    return 2595.0 * np.log10(1.0 + f / 700.0)


def _mel_to_hz(m):
    return 700.0 * (10.0 ** (m / 2595.0) - 1.0)


def melscale_fbanks(n_freqs, f_min, f_max, n_mels, sample_rate):
    # matches torchaudio.functional.melscale_fbanks(norm=None, mel_scale='htk')
    all_freqs = np.linspace(0.0, sample_rate / 2.0, n_freqs)
    m_pts = np.linspace(_hz_to_mel(f_min), _hz_to_mel(f_max), n_mels + 2)
    f_pts = _mel_to_hz(m_pts)
    f_diff = f_pts[1:] - f_pts[:-1]
    slopes = f_pts[None, :] - all_freqs[:, None]
    down = -slopes[:, :-2] / f_diff[:-1]
    up = slopes[:, 2:] / f_diff[1:]
    fb = np.maximum(0.0, np.minimum(down, up))
    return fb.astype(np.float32)                            # (n_freqs, n_mels)


def _build_constants():
    n = np.arange(N_FFT)
    # hann (periodic) with torchaudio normalized=True ("window") baked in
    win = 0.5 - 0.5 * np.cos(2.0 * np.pi * n / N_FFT)
    win = win / np.sqrt(np.sum(win ** 2))
    k = np.arange(1, N_FREQ - 1)                            # bins 1..255 only
    ang = 2.0 * np.pi * np.outer(n, k) / N_FFT
    cos_m = np.cos(ang) * win[:, None]
    sin_m = -np.sin(ang) * win[:, None]
    rhs = np.zeros((N_FFT, RHS_W), np.float32)
    rhs[:, :N_BINS] = cos_m
    rhs[:, HALF:HALF + N_BINS] = sin_m
    fb = melscale_fbanks(N_FREQ, 0.0, SAMPLE_RATE / 2.0, N_MELS, SAMPLE_RATE)
    fb_pad = np.zeros((HALF, N_MELS_PAD), np.float32)
    fb_pad[:N_BINS, :N_MELS] = fb[1:N_FREQ - 1, :]          # drop rows 0 & 256
    # bf16 RHS -> bf16-native MXU path for the dominant DFT matmul
    return jnp.asarray(rhs, dtype=jnp.bfloat16), jnp.asarray(fb_pad)


RHS_CONST, FB_CONST = _build_constants()   # (512, 512) bf16, (256, 128) f32


# ------------------------------- fused kernel -------------------------------
def _fused_mel_rvm_kernel(inv_std_ref, gt_ref, est_ref, rhs_ref, fb_ref, out_ref,
                          *, tile_m, m_total):
    # inv_std_ref : (1,) f32 in SMEM (1 / clamped RMS of ground truth)
    # gt_ref/est_ref : (tile_m, N_FFT) bf16 frames (un-normalized)
    # rhs_ref : (512, 512) bf16 = [win*cos | win*(-sin)], bins 1..255 (padded)
    # fb_ref  : (256, 128) f32 zero-padded mel fbank (rows = bins 1..255)
    # out_ref : (8, 128) f32 per-tile partial band sums
    i = pl.program_id(0)
    inv_std = inv_std_ref[0]
    rhs = rhs_ref[...]
    fb = fb_ref[...]

    def mel_sqrt(x):
        spec = jnp.dot(x, rhs, preferred_element_type=jnp.float32)    # (tm, 512)
        re = spec[:, :HALF]
        im = spec[:, HALF:]
        power = re * re + im * im                                     # (tm, 256)
        mel = jnp.dot(power, fb, preferred_element_type=jnp.float32)  # (tm, 128)
        # z(x / std) == z(x) / std  (DFT -> power -> mel -> sqrt pipeline)
        return jnp.sqrt(jnp.maximum(mel, 0.0)) * inv_std

    z_gt = mel_sqrt(gt_ref[...])
    z_est = mel_sqrt(est_ref[...])

    # rel_db = clip(delta_db - ref_db) == clip(20*log10(max(|d|,1e-6)/max(zgt,c)))
    delta = jnp.abs(z_gt - z_est)
    ratio = jnp.maximum(delta, MIN_120_SCALE) * pl.reciprocal(
        jnp.maximum(z_gt, MIN_ACT_SCALE), approx=True)
    rel = jnp.clip(20.0 * jnp.log10(ratio), MIN_REL_VOL, MAX_REL_VOL)

    # mask zero-padded frame rows AND the padded mel lanes 80..127
    row = i * tile_m + jax.lax.broadcasted_iota(jnp.int32, (tile_m, N_MELS_PAD), 0)
    lane = jax.lax.broadcasted_iota(jnp.int32, (tile_m, N_MELS_PAD), 1)
    rel = jnp.where((row < m_total) & (lane < N_MELS), rel, 0.0)

    # per-tile partial band sums folded to (8, 128): only cheap vreg-wise adds
    # here; the cross-sublane / cross-tile reduction happens in the wrapper.
    out_ref[...] = jnp.sum(rel.reshape(tile_m // 8, 8, N_MELS_PAD), axis=0)


# --------------------------------- wrapper ----------------------------------
@jax.jit
def relative_volume_mel(estimate, ground_truth):
    """estimate, ground_truth: (B, C, T) float32 waveforms. Returns metrics dict."""
    B, C, T = ground_truth.shape
    BC = B * C
    F = 1 + T // HOP                                    # torch.stft(center=True)

    gt32 = ground_truth.reshape(BC, T).astype(jnp.float32)

    # RMS of ground truth; 1/std passed to the kernel as an SMEM scalar
    std = jnp.maximum(jnp.sqrt(jnp.mean(gt32 * gt32)), MIN_INIT_SCALE)
    inv_std = jnp.reshape(1.0 / std, (1,)).astype(jnp.float32)

    gt = gt32.astype(jnp.bfloat16)
    est = estimate.reshape(BC, T).astype(jnp.bfloat16)

    def frames_of(x):
        # center=True reflect pad, then frame f = padded[f*HOP : f*HOP + N_FFT]
        p = jnp.pad(x, ((0, 0), (N_FFT // 2, N_FFT // 2)), mode="reflect")
        p = p[:, :(F + 3) * HOP].reshape(BC, F + 3, HOP)
        fr = jnp.concatenate([p[:, k:k + F, :] for k in range(N_FFT // HOP)],
                             axis=-1)                   # (BC, F, N_FFT)
        return fr.reshape(BC * F, N_FFT)

    fr_gt = frames_of(gt)
    fr_est = frames_of(est)

    M = BC * F
    tile_m = min(TILE_M, _round_up(M, 8))               # sublane-aligned tile
    num_tiles = (M + tile_m - 1) // tile_m
    M_pad = num_tiles * tile_m
    if M_pad > M:
        fr_gt = jnp.pad(fr_gt, ((0, M_pad - M), (0, 0)))
        fr_est = jnp.pad(fr_est, ((0, M_pad - M), (0, 0)))

    kernel = functools.partial(_fused_mel_rvm_kernel, tile_m=tile_m, m_total=M)
    partial_sums = pl.pallas_call(
        kernel,
        out_shape=jax.ShapeDtypeStruct((num_tiles * 8, N_MELS_PAD), jnp.float32),
        grid=(num_tiles,),
        in_specs=[
            pl.BlockSpec(memory_space=pltpu.MemorySpace.SMEM),       # 1/std
            pl.BlockSpec((tile_m, N_FFT), lambda i: (i, 0)),         # gt frames
            pl.BlockSpec((tile_m, N_FFT), lambda i: (i, 0)),         # est frames
            pl.BlockSpec((N_FFT, RHS_W), lambda i: (0, 0)),          # DFT RHS
            pl.BlockSpec((HALF, N_MELS_PAD), lambda i: (0, 0)),      # mel fbank
        ],
        out_specs=pl.BlockSpec((8, N_MELS_PAD), lambda i: (i, 0)),
        compiler_params=pltpu.CompilerParams(
            dimension_semantics=("parallel",),
            vmem_limit_bytes=32 * 1024 * 1024),
    )(inv_std, fr_gt, fr_est, RHS_CONST, FB_CONST)

    # mean over batch, channel, time (all dims except the mel-band dim)
    losses_per_band = partial_sums.sum(axis=0)[:N_MELS] / (BC * F)   # (80,)

    metrics = {f"rvm_{idx}": chunk.mean()
               for idx, chunk in enumerate(jnp.split(losses_per_band, NUM_AGG_BANDS))}
    metrics["rvm"] = losses_per_band.mean()
    return metrics


if __name__ == "__main__":
    key = jax.random.PRNGKey(0)
    k_est, k_gt = jax.random.split(key)
    B, C, T = 2, 1, 2048                               # small shapes; T multiple of hop
    ground_truth = 0.1 * jax.random.normal(k_gt, (B, C, T), dtype=jnp.float32)
    estimate = ground_truth + 0.01 * jax.random.normal(k_est, (B, C, T), dtype=jnp.float32)

    metrics = relative_volume_mel(estimate, ground_truth)
    jax.block_until_ready(metrics)
    print("KERNEL_OK")
</pallas_src>

<mosaic_0001>
module attributes {stable_mosaic.version = 11 : i64} {
  func.func @_fused_mel_rvm_kernel(%arg0: i32, %arg1: memref<1xf32, #tpu.memory_space<smem>>, %arg2: memref<40x512xbf16, #tpu.memory_space<vmem>>, %arg3: memref<40x512xbf16, #tpu.memory_space<vmem>>, %arg4: memref<512x512xbf16, #tpu.memory_space<vmem>>, %arg5: memref<256x128xf32, #tpu.memory_space<vmem>>, %arg6: memref<8x128xf32, #tpu.memory_space<vmem>>) attributes {dimension_semantics = [#tpu.dimension_semantics<parallel>], iteration_bounds = array<i64: 1>, scalar_prefetch = 0 : i64, scratch_operands = 0 : i64, tpu.core_type = #tpu.core_type<tc>, window_params = [{transform_indices = @transform_0, window_bounds = array<i64: 1>}, {transform_indices = @transform_1, window_bounds = array<i64: 40, 512>}, {transform_indices = @transform_2, window_bounds = array<i64: 40, 512>}, {pipeline_mode = #tpu.pipeline_mode<synchronous>, transform_indices = @transform_3, window_bounds = array<i64: 512, 512>}, {pipeline_mode = #tpu.pipeline_mode<synchronous>, transform_indices = @transform_4, window_bounds = array<i64: 256, 128>}, {transform_indices = @transform_5, window_bounds = array<i64: 8, 128>}]} {
    %c0 = arith.constant 0 : index
    %0 = memref.load %arg1[%c0] : memref<1xf32, #tpu.memory_space<smem>>
    %c0_0 = arith.constant 0 : index
    %c0_1 = arith.constant 0 : index
    %1 = vector.load %arg4[%c0_0, %c0_1] : memref<512x512xbf16, #tpu.memory_space<vmem>>, vector<512x512xbf16>
    %c0_2 = arith.constant 0 : index
    %c0_3 = arith.constant 0 : index
    %2 = vector.load %arg5[%c0_2, %c0_3] : memref<256x128xf32, #tpu.memory_space<vmem>>, vector<256x128xf32>
    %c0_4 = arith.constant 0 : index
    %c0_5 = arith.constant 0 : index
    %3 = vector.load %arg2[%c0_4, %c0_5] : memref<40x512xbf16, #tpu.memory_space<vmem>>, vector<40x512xbf16>
    %cst = arith.constant dense<0.000000e+00> : vector<40x512xf32>
    %4 = tpu.matmul %3, %1, %cst {dimension_numbers = #tpu.dot_dimension_numbers<[1], [0], [0], [1], [0, 0, 1, 1], [], []>} : vector<40x512xbf16>, vector<512x512xbf16>, vector<40x512xf32> -> vector<40x512xf32>
    %5 = vector.extract_strided_slice %4 {offsets = [0, 0], sizes = [40, 256], strides = [1, 1]} : vector<40x512xf32> to vector<40x256xf32>
    %6 = vector.extract_strided_slice %4 {offsets = [0, 256], sizes = [40, 256], strides = [1, 1]} : vector<40x512xf32> to vector<40x256xf32>
    %7 = arith.mulf %5, %5 : vector<40x256xf32>
    %8 = arith.mulf %6, %6 : vector<40x256xf32>
    %9 = arith.addf %7, %8 : vector<40x256xf32>
    %cst_6 = arith.constant dense<0.000000e+00> : vector<40x128xf32>
    %10 = tpu.matmul %9, %2, %cst_6 {dimension_numbers = #tpu.dot_dimension_numbers<[1], [0], [0], [1], [0, 0, 1, 1], [], []>} : vector<40x256xf32>, vector<256x128xf32>, vector<40x128xf32> -> vector<40x128xf32>
    %cst_7 = arith.constant 0.000000e+00 : f32
    %11 = vector.broadcast %cst_7 : f32 to vector<40x128xf32>
    %12 = arith.maximumf %10, %11 : vector<40x128xf32>
    %13 = math.sqrt %12 : vector<40x128xf32>
    %14 = vector.broadcast %0 : f32 to vector<40x128xf32>
    %15 = arith.mulf %13, %14 : vector<40x128xf32>
    %c0_8 = arith.constant 0 : index
    %c0_9 = arith.constant 0 : index
    %16 = vector.load %arg3[%c0_8, %c0_9] : memref<40x512xbf16, #tpu.memory_space<vmem>>, vector<40x512xbf16>
    %cst_10 = arith.constant dense<0.000000e+00> : vector<40x512xf32>
    %17 = tpu.matmul %16, %1, %cst_10 {dimension_numbers = #tpu.dot_dimension_numbers<[1], [0], [0], [1], [0, 0, 1, 1], [], []>} : vector<40x512xbf16>, vector<512x512xbf16>, vector<40x512xf32> -> vector<40x512xf32>
    %18 = vector.extract_strided_slice %17 {offsets = [0, 0], sizes = [40, 256], strides = [1, 1]} : vector<40x512xf32> to vector<40x256xf32>
    %19 = vector.extract_strided_slice %17 {offsets = [0, 256], sizes = [40, 256], strides = [1, 1]} : vector<40x512xf32> to vector<40x256xf32>
    %20 = arith.mulf %18, %18 : vector<40x256xf32>
    %21 = arith.mulf %19, %19 : vector<40x256xf32>
    %22 = arith.addf %20, %21 : vector<40x256xf32>
    %cst_11 = arith.constant dense<0.000000e+00> : vector<40x128xf32>
    %23 = tpu.matmul %22, %2, %cst_11 {dimension_numbers = #tpu.dot_dimension_numbers<[1], [0], [0], [1], [0, 0, 1, 1], [], []>} : vector<40x256xf32>, vector<256x128xf32>, vector<40x128xf32> -> vector<40x128xf32>
    %cst_12 = arith.constant 0.000000e+00 : f32
    %24 = vector.broadcast %cst_12 : f32 to vector<40x128xf32>
    %25 = arith.maximumf %23, %24 : vector<40x128xf32>
    %26 = math.sqrt %25 : vector<40x128xf32>
    %27 = vector.broadcast %0 : f32 to vector<40x128xf32>
    %28 = arith.mulf %26, %27 : vector<40x128xf32>
    %29 = arith.subf %15, %28 : vector<40x128xf32>
    %30 = math.absf %29 : vector<40x128xf32>
    %cst_13 = arith.constant 9.99999997E-7 : f32
    %31 = vector.broadcast %cst_13 : f32 to vector<40x128xf32>
    %32 = arith.maximumf %30, %31 : vector<40x128xf32>
    %cst_14 = arith.constant 0.0562341325 : f32
    %33 = vector.broadcast %cst_14 : f32 to vector<40x128xf32>
    %34 = arith.maximumf %15, %33 : vector<40x128xf32>
    %35 = tpu.reciprocal %34 {approx = true} : vector<40x128xf32> -> vector<40x128xf32>
    %36 = arith.mulf %32, %35 : vector<40x128xf32>
    %37 = math.log %36 : vector<40x128xf32>
    %cst_15 = arith.constant 0.434294492 : f32
    %38 = vector.broadcast %cst_15 : f32 to vector<40x128xf32>
    %39 = arith.mulf %37, %38 : vector<40x128xf32>
    %cst_16 = arith.constant 2.000000e+01 : f32
    %40 = vector.broadcast %cst_16 : f32 to vector<40x128xf32>
    %41 = arith.mulf %40, %39 : vector<40x128xf32>
    %cst_17 = arith.constant -2.500000e+01 : f32
    %cst_18 = arith.constant 2.500000e+01 : f32
    %42 = vector.broadcast %cst_17 : f32 to vector<40x128xf32>
    %43 = arith.maximumf %42, %41 : vector<40x128xf32>
    %44 = vector.broadcast %cst_18 : f32 to vector<40x128xf32>
    %45 = arith.minimumf %44, %43 : vector<40x128xf32>
    %c40_i32 = arith.constant 40 : i32
    %46 = arith.muli %arg0, %c40_i32 : i32
    %47 = tpu.iota {dimensions = array<i32: 0>} : vector<40x128xi32>
    %48 = vector.broadcast %46 : i32 to vector<40x128xi32>
    %49 = arith.addi %48, %47 : vector<40x128xi32>
    %50 = tpu.iota {dimensions = array<i32: 1>} : vector<40x128xi32>
    %c34_i32 = arith.constant 34 : i32
    %51 = vector.broadcast %c34_i32 : i32 to vector<40x128xi32>
    %52 = arith.cmpi slt, %49, %51 : vector<40x128xi32>
    %c80_i32 = arith.constant 80 : i32
    %53 = vector.broadcast %c80_i32 : i32 to vector<40x128xi32>
    %54 = arith.cmpi slt, %50, %53 : vector<40x128xi32>
    %55 = arith.andi %52, %54 : vector<40x128xi1>
    %cst_19 = arith.constant 0.000000e+00 : f32
    %56 = vector.broadcast %cst_19 : f32 to vector<40x128xf32>
    %57 = arith.select %55, %45, %56 : vector<40x128xi1>, vector<40x128xf32>
    %58 = vector.shape_cast %57 : vector<40x128xf32> to vector<5x8x128xf32>
    %cst_20 = arith.constant dense<0.000000e+00> : vector<8x128xf32>
    %59 = vector.multi_reduction <add>, %58, %cst_20 [0] : vector<5x8x128xf32> to vector<8x128xf32>
    %c0_21 = arith.constant 0 : index
    %c0_22 = arith.constant 0 : index
    %60 = vector.load %arg6[%c0_21, %c0_22] : memref<8x128xf32, #tpu.memory_space<vmem>>, vector<8x128xf32>
    tpu.vector_store %arg6[%c0_21, %c0_22], %59 {strides = array<i32>} : memref<8x128xf32, #tpu.memory_space<vmem>>, vector<8x128xf32>,
    return
  }
  func.func @transform_0(%arg0: i32) -> i32 {
    %c0_i32 = arith.constant 0 : i32
    %c0_i32_0 = arith.constant 0 : i32
    return %c0_i32 : i32
  }
  func.func @transform_1(%arg0: i32) -> (i32, i32) {
    %c0_i32 = arith.constant 0 : i32
    %c0_i32_0 = arith.constant 0 : i32
    return %arg0, %c0_i32 : i32, i32
  }
  func.func @transform_2(%arg0: i32) -> (i32, i32) {
    %c0_i32 = arith.constant 0 : i32
    %c0_i32_0 = arith.constant 0 : i32
    return %arg0, %c0_i32 : i32, i32
  }
  func.func @transform_3(%arg0: i32) -> (i32, i32) {
    %c0_i32 = arith.constant 0 : i32
    %c0_i32_0 = arith.constant 0 : i32
    %c0_i32_1 = arith.constant 0 : i32
    return %c0_i32, %c0_i32_0 : i32, i32
  }
  func.func @transform_4(%arg0: i32) -> (i32, i32) {
    %c0_i32 = arith.constant 0 : i32
    %c0_i32_0 = arith.constant 0 : i32
    %c0_i32_1 = arith.constant 0 : i32
    return %c0_i32, %c0_i32_0 : i32, i32
  }
  func.func @transform_5(%arg0: i32) -> (i32, i32) {
    %c0_i32 = arith.constant 0 : i32
    %c0_i32_0 = arith.constant 0 : i32
    return %arg0, %c0_i32 : i32, i32
  }
}

</mosaic_0001>

<bundles_post_ra>
// kernel: relative_volume_mel.1
= control target key start
LH: loop header
LB: loop body
LE: loop exit
PB: predicated region body
PF: predicated region fallthrough
CT: control target
= control target key end

     0   :  { %s3858_s3 = inlined_call_operand.vmem [shape: bf16[512,512], index: 3, kind: input, shape index: {}]   ;;  %s3859_s1 = inlined_call_operand.vmem [shape: bf16[40,512], index: 1, kind: input, shape index: {}]   ;;  %s3860_s4 = inlined_call_operand.vmem [shape: f32[256,128], index: 4, kind: input, shape index: {}]   ;;  %s3861_s2 = inlined_call_operand.vmem [shape: bf16[40,512], index: 2, kind: input, shape index: {}]   ;;  %s3862_s0 = inlined_call_operand.<no memory space> [shape: f32[1], index: 0, kind: input, shape index: {}]   ;;  %s3863_s5 = inlined_call_operand.vmem [shape: f32[8,128], index: 5, kind: output, shape index: {}]  }
   0x1   :  { %v2455_v0 = vld [vmem:[%s3858_s3 + $0xe4] ss:$16 sps:$4 sm:$0xff]   ;;  %v2464_v2 = vld [vmem:[%s3858_s3 + $0xe0] ss:$16 sps:$4 sm:$0xff]   ;;  %v2683_v51 = vld [vmem:[%s3859_s1 + $0xc] ss:$16 sps:$4 sm:$0xff]  }
   0x2   :  { %v2122_v1 = vld [vmem:[%s3858_s3 + $0x2e4] ss:$16 sps:$4 sm:$0xff]   ;;  %886 = vmatprep.subr.bf16.mxu0 %v2455_v0  ;;  %v2125_v3 = vld [vmem:[%s3858_s3 + $0x2e0] ss:$16 sps:$4 sm:$0xff]   ;;  %979 = vmatprep.mubr.bf16.mxu1 %v2683_v51 }
   0x3   :  { %947 = vmatprep.subr.bf16.mxu1 %v2122_v1  ;;  %v2472_v4 = vld [vmem:[%s3858_s3 + $0xc4] ss:$16 sps:$4 sm:$0xff]   ;;  %887 = vmatpush1.bf16.msra.mxu0 %v2464_v2  ;;  %v2481_v6 = vld [vmem:[%s3858_s3 + $0xc0] ss:$16 sps:$4 sm:$0xff]  }
   0x4   :  { %948 = vmatpush1.bf16.msra.mxu1 %v2125_v3  ;;  %v2128_v5 = vld [vmem:[%s3858_s3 + $0x2c4] ss:$16 sps:$4 sm:$0xff]   ;;  %888 = vmatprep.subr.bf16.mxu0 %v2472_v4  ;;  %v2131_v7 = vld [vmem:[%s3858_s3 + $0x2c0] ss:$16 sps:$4 sm:$0xff]  }
   0x5   :  { %949 = vmatprep.subr.bf16.mxu1 %v2128_v5  ;;  %v2490_v8 = vld [vmem:[%s3858_s3 + $0xa4] ss:$16 sps:$4 sm:$0xff]   ;;  %v2498_v10 = vld [vmem:[%s3858_s3 + $0xa0] ss:$16 sps:$4 sm:$0xff]   ;;  %v2753_v5 = vld [vmem:[%s3858_s3 + $0xec] ss:$16 sps:$4 sm:$0xff]  }
   0x6   :  { %v2134_v9 = vld [vmem:[%s3858_s3 + $0x2a4] ss:$16 sps:$4 sm:$0xff]   ;;  %v2137_v11 = vld [vmem:[%s3858_s3 + $0x2a0] ss:$16 sps:$4 sm:$0xff]  }
   0x7   :  { %889 = vmatpush1.bf16.msra.mxu0 %v2481_v6  ;;  %v2507_v12 = vld [vmem:[%s3858_s3 + $0x84] ss:$16 sps:$4 sm:$0xff]   ;;  %v2516_v14 = vld [vmem:[%s3858_s3 + $0x80] ss:$16 sps:$4 sm:$0xff]  }
   0x8   :  { %950 = vmatpush1.bf16.msra.mxu1 %v2131_v7  ;;  %890 = vmatprep.subr.bf16.mxu0 %v2490_v8  ;;  %v2140_v13 = vld [vmem:[%s3858_s3 + $0x284] ss:$16 sps:$4 sm:$0xff]   ;;  %v2143_v15 = vld [vmem:[%s3858_s3 + $0x280] ss:$16 sps:$4 sm:$0xff]   ;;  %v2227_v7 = vld [vmem:[%s3858_s3 + $0x2ec] ss:$16 sps:$4 sm:$0xff]  }
   0x9   :  { %951 = vmatprep.subr.bf16.mxu1 %v2134_v9  ;;  %v2525_v16 = vld [vmem:[%s3858_s3 + $0x64] ss:$16 sps:$4 sm:$0xff]   ;;  %v2534_v18 = vld [vmem:[%s3858_s3 + $0x60] ss:$16 sps:$4 sm:$0xff]  }
   0xa   :  { %v2146_v17 = vld [vmem:[%s3858_s3 + $0x264] ss:$16 sps:$4 sm:$0xff]   ;;  %v2149_v19 = vld [vmem:[%s3858_s3 + $0x260] ss:$16 sps:$4 sm:$0xff]  }
   0xb   :  { %891 = vmatpush1.bf16.msra.mxu0 %v2498_v10  ;;  %v2543_v20 = vld [vmem:[%s3858_s3 + $0x44] ss:$16 sps:$4 sm:$0xff]   ;;  %v2552_v22 = vld [vmem:[%s3858_s3 + $0x40] ss:$16 sps:$4 sm:$0xff]  }
   0xc   :  { %952 = vmatpush1.bf16.msra.mxu1 %v2137_v11  ;;  %892 = vmatprep.subr.bf16.mxu0 %v2507_v12  ;;  %v2152_v21 = vld [vmem:[%s3858_s3 + $0x244] ss:$16 sps:$4 sm:$0xff]   ;;  %v2155_v23 = vld [vmem:[%s3858_s3 + $0x240] ss:$16 sps:$4 sm:$0xff]   ;;  %v2767_v11 = vld [vmem:[%s3859_s1 + $0x8] ss:$16 sps:$4 sm:$0xff]  }
   0xd   :  { %953 = vmatprep.subr.bf16.mxu1 %v2140_v13  ;;  %v2561_v24 = vld [vmem:[%s3858_s3 + $0x24] ss:$16 sps:$4 sm:$0xff]   ;;  %v2570_v26 = vld [vmem:[%s3858_s3 + $0x20] ss:$16 sps:$4 sm:$0xff]   ;;  %v2772_v13 = vld [vmem:[%s3858_s3 + $0xe8] ss:$16 sps:$4 sm:$0xff]  }
   0xe   :  { %v2158_v25 = vld [vmem:[%s3858_s3 + $0x224] ss:$16 sps:$4 sm:$0xff]   ;;  %v2161_v27 = vld [vmem:[%s3858_s3 + $0x220] ss:$16 sps:$4 sm:$0xff]  }
   0xf   :  { %893 = vmatpush1.bf16.msra.mxu0 %v2516_v14  ;;  %v2579_v28 = vld [vmem:[%s3858_s3 + $0x4] ss:$16 sps:$4 sm:$0xff]   ;;  %v2588_v30 = vld [vmem:[%s3858_s3] ss:$16 sps:$4 sm:$0xff]  }
  0x10   :  { %954 = vmatpush1.bf16.msra.mxu1 %v2143_v15  ;;  %894 = vmatprep.subr.bf16.mxu0 %v2525_v16  ;;  %v2164_v29 = vld [vmem:[%s3858_s3 + $0x204] ss:$16 sps:$4 sm:$0xff]   ;;  %v2167_v31 = vld [vmem:[%s3858_s3 + $0x200] ss:$16 sps:$4 sm:$0xff]   ;;  %v2225_v15 = vld [vmem:[%s3858_s3 + $0x2e8] ss:$16 sps:$4 sm:$0xff]  }
  0x11   :  { %955 = vmatprep.subr.bf16.mxu1 %v2146_v17  ;;  %v2597_v32 = vld [vmem:[%s3858_s3 + $0x1e4] ss:$16 sps:$4 sm:$0xff]   ;;  %v2606_v34 = vld [vmem:[%s3858_s3 + $0x1e0] ss:$16 sps:$4 sm:$0xff]   ;;  %v2781_v17 = vld [vmem:[%s3858_s3 + $0xcc] ss:$16 sps:$4 sm:$0xff]  }
  0x12   :  { %v2170_v33 = vld [vmem:[%s3858_s3 + $0x3e4] ss:$16 sps:$4 sm:$0xff]   ;;  %v2173_v35 = vld [vmem:[%s3858_s3 + $0x3e0] ss:$16 sps:$4 sm:$0xff]  }
  0x13   :  { %895 = vmatpush1.bf16.msra.mxu0 %v2534_v18  ;;  %v2615_v36 = vld [vmem:[%s3858_s3 + $0x1c4] ss:$16 sps:$4 sm:$0xff]   ;;  %v2624_v38 = vld [vmem:[%s3858_s3 + $0x1c0] ss:$16 sps:$4 sm:$0xff]  }
  0x14   :  { %956 = vmatpush1.bf16.msra.mxu1 %v2149_v19  ;;  %896 = vmatprep.subr.bf16.mxu0 %v2543_v20  ;;  %v2176_v37 = vld [vmem:[%s3858_s3 + $0x3c4] ss:$16 sps:$4 sm:$0xff]   ;;  %v2179_v39 = vld [vmem:[%s3858_s3 + $0x3c0] ss:$16 sps:$4 sm:$0xff]   ;;  %v2233_v19 = vld [vmem:[%s3858_s3 + $0x2cc] ss:$16 sps:$4 sm:$0xff]  }
  0x15   :  { %957 = vmatprep.subr.bf16.mxu1 %v2152_v21  ;;  %v2633_v40 = vld [vmem:[%s3858_s3 + $0x1a4] ss:$16 sps:$4 sm:$0xff]   ;;  %v2642_v42 = vld [vmem:[%s3858_s3 + $0x1a0] ss:$16 sps:$4 sm:$0xff]   ;;  %v2792_v21 = vld [vmem:[%s3858_s3 + $0xc8] ss:$16 sps:$4 sm:$0xff]  }
  0x16   :  { %v2182_v41 = vld [vmem:[%s3858_s3 + $0x3a4] ss:$16 sps:$4 sm:$0xff]   ;;  %v2185_v43 = vld [vmem:[%s3858_s3 + $0x3a0] ss:$16 sps:$4 sm:$0xff]  }
  0x17   :  { %897 = vmatpush1.bf16.msra.mxu0 %v2552_v22  ;;  %v2651_v44 = vld [vmem:[%s3858_s3 + $0x184] ss:$16 sps:$4 sm:$0xff]   ;;  %v2660_v46 = vld [vmem:[%s3858_s3 + $0x180] ss:$16 sps:$4 sm:$0xff]  }
  0x18   :  { %958 = vmatpush1.bf16.msra.mxu1 %v2155_v23  ;;  %898 = vmatprep.subr.bf16.mxu0 %v2561_v24  ;;  %v2188_v45 = vld [vmem:[%s3858_s3 + $0x384] ss:$16 sps:$4 sm:$0xff]   ;;  %v2191_v47 = vld [vmem:[%s3858_s3 + $0x380] ss:$16 sps:$4 sm:$0xff]   ;;  %v2231_v23 = vld [vmem:[%s3858_s3 + $0x2c8] ss:$16 sps:$4 sm:$0xff]  }
  0x19   :  { %959 = vmatprep.subr.bf16.mxu1 %v2158_v25  ;;  %v2668_v48 = vld [vmem:[%s3858_s3 + $0x164] ss:$16 sps:$4 sm:$0xff]   ;;  %v2689_v52 = vld [vmem:[%s3858_s3 + $0x160] ss:$16 sps:$4 sm:$0xff]   ;;  %v2801_v25 = vld [vmem:[%s3858_s3 + $0xac] ss:$16 sps:$4 sm:$0xff]  }
  0x1a   :  { %v2673_v49 = vld [vmem:[%s3859_s1 + $0x4] ss:$16 sps:$4 sm:$0xff]   ;;  %v2197_v53 = vld [vmem:[%s3858_s3 + $0x360] ss:$16 sps:$4 sm:$0xff]  }
  0x1b   :  { %899 = vmatpush1.bf16.msra.mxu0 %v2570_v26  ;;  %v2194_v50 = vld [vmem:[%s3858_s3 + $0x364] ss:$16 sps:$4 sm:$0xff]   ;;  %918 = vmatprep.mubr.bf16.mxu0 %v2673_v49  ;;  %v2708_v56 = vld [vmem:[%s3858_s3 + $0x140] ss:$16 sps:$4 sm:$0xff]  }
  0x1c   :  { %960 = vmatpush1.bf16.msra.mxu1 %v2161_v27  ;;  %900 = vmatprep.subr.bf16.mxu0 %v2579_v28  ;;  %v2699_v54 = vld [vmem:[%s3858_s3 + $0x144] ss:$16 sps:$4 sm:$0xff]   ;;  %v2203_v57 = vld [vmem:[%s3858_s3 + $0x340] ss:$16 sps:$4 sm:$0xff]   ;;  %v2239_v27 = vld [vmem:[%s3858_s3 + $0x2ac] ss:$16 sps:$4 sm:$0xff]  }
  0x1d   :  { %961 = vmatprep.subr.bf16.mxu1 %v2164_v29  ;;  %v2200_v55 = vld [vmem:[%s3858_s3 + $0x344] ss:$16 sps:$4 sm:$0xff]   ;;  %v2726_v60 = vld [vmem:[%s3858_s3 + $0x120] ss:$16 sps:$4 sm:$0xff]   ;;  %v2810_v29 = vld [vmem:[%s3858_s3 + $0xa8] ss:$16 sps:$4 sm:$0xff]  }
  0x1e   :  { %v2717_v58 = vld [vmem:[%s3858_s3 + $0x124] ss:$16 sps:$4 sm:$0xff]   ;;  %v2209_v61 = vld [vmem:[%s3858_s3 + $0x320] ss:$16 sps:$4 sm:$0xff]  }
  0x1f   :  { %901 = vmatpush1.bf16.msra.mxu0 %v2588_v30  ;;  %v2206_v59 = vld [vmem:[%s3858_s3 + $0x324] ss:$16 sps:$4 sm:$0xff]   ;;  %v2744_v1 = vld [vmem:[%s3858_s3 + $0x100] ss:$16 sps:$4 sm:$0xff]  }
  0x20   :  { %962 = vmatpush1.bf16.msra.mxu1 %v2167_v31  ;;  %902 = vmatprep.subr.bf16.mxu0 %v2597_v32  ;;  %v2735_v62 = vld [vmem:[%s3858_s3 + $0x104] ss:$16 sps:$4 sm:$0xff]   ;;  %v2215_v3 = vld [vmem:[%s3858_s3 + $0x300] ss:$16 sps:$4 sm:$0xff]   ;;  %v2237_v31 = vld [vmem:[%s3858_s3 + $0x2a8] ss:$16 sps:$4 sm:$0xff]  }
  0x21   :  { %963 = vmatprep.subr.bf16.mxu1 %v2170_v33  ;;  %v2212_v63 = vld [vmem:[%s3858_s3 + $0x304] ss:$16 sps:$4 sm:$0xff]   ;;  %v2762_v9 = vld [vmem:[%s3859_s1] ss:$16 sps:$4 sm:$0xff]   ;;  %v2819_v33 = vld [vmem:[%s3858_s3 + $0x8c] ss:$16 sps:$4 sm:$0xff]  }
  0x23   :  { %903 = vmatpush2.bf16.msra.mxu0 %v2606_v34 }
  0x24   :  { %964 = vmatpush2.bf16.msra.mxu1 %v2173_v35  ;;  %904 = vmatprep.subr.bf16.mxu0 %v2615_v36  ;;  %v2825_v35 = vld [vmem:[%s3858_s3 + $0x28c] ss:$16 sps:$4 sm:$0xff]  }
  0x25   :  { %965 = vmatprep.subr.bf16.mxu1 %v2176_v37  ;;  %3911 = vst [vmem:[#allocation3_spill] sm:$0xff] %v2825_v35  ;;  %v2830_v37 = vld [vmem:[%s3858_s3 + $0x88] ss:$16 sps:$4 sm:$0xff]  }
  0x27   :  { %905 = vmatpush2.bf16.msra.mxu0 %v2624_v38 }
  0x28   :  { %966 = vmatpush2.bf16.msra.mxu1 %v2179_v39  ;;  %906 = vmatprep.subr.bf16.mxu0 %v2633_v40  ;;  %v2835_v39 = vld [vmem:[%s3858_s3 + $0x288] ss:$16 sps:$4 sm:$0xff]  }
  0x29   :  { %967 = vmatprep.subr.bf16.mxu1 %v2182_v41  ;;  %3912 = vst [vmem:[#allocation4_spill] sm:$0xff] %v2835_v39  ;;  %v2840_v41 = vld [vmem:[%s3858_s3 + $0x6c] ss:$16 sps:$4 sm:$0xff]  }
  0x2b   :  { %907 = vmatpush2.bf16.msra.mxu0 %v2642_v42 }
  0x2c   :  { %968 = vmatpush2.bf16.msra.mxu1 %v2185_v43  ;;  %908 = vmatprep.subr.bf16.mxu0 %v2651_v44  ;;  %v2845_v43 = vld [vmem:[%s3858_s3 + $0x26c] ss:$16 sps:$4 sm:$0xff]  }
  0x2d   :  { %969 = vmatprep.subr.bf16.mxu1 %v2188_v45  ;;  %3913 = vst [vmem:[#allocation5_spill] sm:$0xff] %v2845_v43  ;;  %v2850_v45 = vld [vmem:[%s3859_s1 + $0x24] ss:$16 sps:$4 sm:$0xff]  }
  0x2f   :  { %909 = vmatpush2.bf16.msra.mxu0 %v2660_v46 }
  0x30   :  { %970 = vmatpush2.bf16.msra.mxu1 %v2191_v47  ;;  %910 = vmatprep.subr.bf16.mxu0 %v2668_v48  ;;  %v2856_v47 = vld [vmem:[%s3859_s1 + $0x2c] ss:$16 sps:$4 sm:$0xff]  }
  0x31   :  { %971 = vmatprep.subr.bf16.mxu1 %v2194_v50  ;;  %v2861_v50 = vld [vmem:[%s3859_s1 + $0x20] ss:$16 sps:$4 sm:$0xff]  }
  0x33   :  { %911 = vmatpush2.bf16.msra.mxu0 %v2689_v52 }
  0x34   :  { %972 = vmatpush2.bf16.msra.mxu1 %v2197_v53  ;;  %912 = vmatprep.subr.bf16.mxu0 %v2699_v54  ;;  %v2868_v53 = vld [vmem:[%s3859_s1 + $0x28] ss:$16 sps:$4 sm:$0xff]  }
  0x35   :  { %973 = vmatprep.subr.bf16.mxu1 %v2200_v55  ;;  %v2875_v55 = vld [vmem:[%s3858_s3 + $0x68] ss:$16 sps:$4 sm:$0xff]  }
  0x37   :  { %913 = vmatpush2.bf16.msra.mxu0 %v2708_v56 }
  0x38   :  { %974 = vmatpush2.bf16.msra.mxu1 %v2203_v57  ;;  %914 = vmatprep.subr.bf16.mxu0 %v2717_v58  ;;  %v2880_v57 = vld [vmem:[%s3858_s3 + $0x268] ss:$16 sps:$4 sm:$0xff]  }
  0x39   :  { %975 = vmatprep.subr.bf16.mxu1 %v2206_v59  ;;  %3914 = vst [vmem:[#allocation6_spill] sm:$0xff] %v2880_v57  ;;  %v2889_v59 = vld [vmem:[%s3858_s3 + $0x4c] ss:$16 sps:$4 sm:$0xff]  }
  0x3b   :  { %915 = vmatpush2.bf16.msra.mxu0 %v2726_v60 }
  0x3c   :  { %976 = vmatpush2.bf16.msra.mxu1 %v2209_v61  ;;  %916 = vmatprep.subr.bf16.mxu0 %v2735_v62  ;;  %v2896_v61 = vld [vmem:[%s3858_s3 + $0x24c] ss:$16 sps:$4 sm:$0xff]  }
  0x3d   :  { %977 = vmatprep.subr.bf16.mxu1 %v2212_v63  ;;  %3915 = vst [vmem:[#allocation7_spill] sm:$0xff] %v2896_v61  ;;  %v190_v63 = vld [vmem:[%s3859_s1 + $0x40] sm:$0xff] }
  0x3f   :  { %917 = vmatpush2.bf16.msra.mxu0 %v2744_v1 }
  0x40   :  { %978 = vmatpush2.bf16.msra.mxu1 %v2215_v3  ;;  %1008 = vmatprep.subr.bf16.mxu0 %v2753_v5  ;;  %v2901_v3 = vcombine.high %v190_v63, %v190_v63 }
  0x41   :  { %1069 = vmatprep.subr.bf16.mxu1 %v2227_v7  ;;  %v191_v7 = vld [vmem:[%s3859_s1 + $0x48] sm:$0xff] }
  0x42   :  { %919 = vmatmul.mubr.bf16.vlgmr.msra.gmra.mxu0 %v2762_v9 }
  0x43   :  { %980 = vmatmul.mubr.bf16.vlgmr.msra.gmra.mxu1 %v2767_v11  ;;  %1009 = vmatpush1.bf16.msra.mxu0 %v2772_v13 }
  0x44   :  { %1070 = vmatpush1.bf16.msra.mxu1 %v2225_v15  ;;  %1010 = vmatprep.subr.bf16.mxu0 %v2781_v17  ;;  %v2906_v15 = vcombine.low %v190_v63, %v190_v63  ;;  %v2929_v63 = vld [vmem:[%s3858_s3 + $0x2c] ss:$16 sps:$4 sm:$0xff]  }
  0x45   :  { %1071 = vmatprep.subr.bf16.mxu1 %v2233_v19  ;;  %928 = vmatprep.mubr.bf16.mxu0 %v2850_v45  ;;  %v2913_v19 = vld [vmem:[%s3858_s3 + $0x48] ss:$16 sps:$4 sm:$0xff]  }
  0x46   :  { %989 = vmatprep.mubr.bf16.mxu1 %v2856_v47 }
  0x47   :  { %1011 = vmatpush1.bf16.msra.mxu0 %v2792_v21 }
  0x48   :  { %1072 = vmatpush1.bf16.msra.mxu1 %v2231_v23  ;;  %1012 = vmatprep.subr.bf16.mxu0 %v2801_v25  ;;  %v2918_v23 = vld [vmem:[%s3858_s3 + $0x248] ss:$16 sps:$4 sm:$0xff]  }
  0x49   :  { %1073 = vmatprep.subr.bf16.mxu1 %v2239_v27  ;;  %3916 = vst [vmem:[#allocation8_spill] sm:$0xff] %v2918_v23  ;;  %v2920_v27 = vcombine.high %v191_v7, %v191_v7 }
  0x4a   :  { %929 = vmatmul.mubr.bf16.gmra.mxu0 %v2861_v50 }
  0x4b   :  { %1013 = vmatpush1.bf16.msra.mxu0 %v2810_v29  ;;  %990 = vmatmul.mubr.bf16.gmra.mxu1 %v2868_v53 }
  0x4c   :  { %1074 = vmatpush1.bf16.msra.mxu1 %v2237_v31  ;;  %1014 = vmatprep.subr.bf16.mxu0 %v2819_v33  ;;  %v2922_v31 = vcombine.low %v191_v7, %v191_v7  ;;  %v2945_v7 = vld [vmem:[%s3858_s3 + $0x28] ss:$16 sps:$4 sm:$0xff]  }
  0x4d   :  { %1075 = vmatprep.subr.bf16.mxu1 %v2825_v35  ;;  %938 = vmatprep.mubr.bf16.mxu0 %v2901_v3  ;;  %v3007_v35 = vld [vmem:[%s3858_s3 + $0x1cc] ss:$16 sps:$4 sm:$0xff]  }
  0x4e   :  { %999 = vmatprep.mubr.bf16.mxu1 %v2920_v27  ;;  %3925 = vst [vmem:[#allocation17_spill] sm:$0xff] %v3007_v35 }
  0x4f   :  { %1015 = vmatpush1.bf16.msra.mxu0 %v2830_v37 }
  0x50   :  { %1076 = vmatpush1.bf16.msra.mxu1 %v2835_v39  ;;  %1016 = vmatprep.subr.bf16.mxu0 %v2840_v41  ;;  %v2976_v39 = vld [vmem:[%s3858_s3 + $0x208] ss:$16 sps:$4 sm:$0xff]  }
  0x51   :  { %1077 = vmatprep.subr.bf16.mxu1 %v2845_v43  ;;  %v2957_v43 = vld [vmem:[%s3858_s3 + $0xc] ss:$16 sps:$4 sm:$0xff]   ;;  %3920 = vst [vmem:[#allocation12_spill] sm:$0xff] %v2976_v39 }
  0x52   :  { %939 = vmatmul.mubr.bf16.gmra.mxu0 %v2906_v15 }
  0x53   :  { %1017 = vmatpush1.bf16.msra.mxu0 %v2875_v55  ;;  %1000 = vmatmul.mubr.bf16.gmra.mxu1 %v2922_v31 }
  0x54   :  { %1078 = vmatpush1.bf16.msra.mxu1 %v2880_v57  ;;  %1018 = vmatprep.subr.bf16.mxu0 %v2889_v59  ;;  %v2934_v57 = vld [vmem:[%s3858_s3 + $0x22c] ss:$16 sps:$4 sm:$0xff]  }
  0x55   :  { %1079 = vmatprep.subr.bf16.mxu1 %v2896_v61  ;;  %3917 = vst [vmem:[#allocation9_spill] sm:$0xff] %v2934_v57  ;;  %v2950_v61 = vld [vmem:[%s3858_s3 + $0x228] ss:$16 sps:$4 sm:$0xff]   ;;  %1040 = vmatprep.mubr.bf16.mxu0 %v2673_v49  ;;  %v2983_v49 = vld [vmem:[%s3858_s3 + $0x1ec] ss:$16 sps:$4 sm:$0xff]  }
  0x56   :  { %3918 = vst [vmem:[#allocation10_spill] sm:$0xff] %v2950_v61  ;;  %1101 = vmatprep.mubr.bf16.mxu1 %v2683_v51  ;;  %3921 = vst [vmem:[#allocation13_spill] sm:$0xff] %v2983_v49  ;;  %v2988_v51 = vld [vmem:[%s3858_s3 + $0x3ec] ss:$16 sps:$4 sm:$0xff]  }
  0x57   :  { %1019 = vmatpush1.bf16.msra.mxu0 %v2913_v19  ;;  %3922 = vst [vmem:[#allocation14_spill] sm:$0xff] %v2988_v51 }
  0x58   :  { %1080 = vmatpush1.bf16.msra.mxu1 %v2918_v23  ;;  %1020 = vmatprep.subr.bf16.mxu0 %v2929_v63  ;;  %v2962_v23 = vld [vmem:[%s3858_s3 + $0x20c] ss:$16 sps:$4 sm:$0xff]  }
  0x59   :  { %1081 = vmatprep.subr.bf16.mxu1 %v2934_v57  ;;  %3919 = vst [vmem:[#allocation11_spill] sm:$0xff] %v2962_v23  ;;  %v2971_v57 = vld [vmem:[%s3858_s3 + $0x8] ss:$16 sps:$4 sm:$0xff]  }
  0x5b   :  { %1021 = vmatpush1.bf16.msra.mxu0 %v2945_v7 }
  0x5c   :  { %1082 = vmatpush1.bf16.msra.mxu1 %v2950_v61  ;;  %1022 = vmatprep.subr.bf16.mxu0 %v2957_v43  ;;  %v2995_v61 = vld [vmem:[%s3858_s3 + $0x1e8] ss:$16 sps:$4 sm:$0xff]  }
  0x5d   :  { %1083 = vmatprep.subr.bf16.mxu1 %v2962_v23  ;;  %3923 = vst [vmem:[#allocation15_spill] sm:$0xff] %v2995_v61  ;;  %v3000_v23 = vld [vmem:[%s3858_s3 + $0x3e8] ss:$16 sps:$4 sm:$0xff]  }
  0x5e   :  { %3924 = vst [vmem:[#allocation16_spill] sm:$0xff] %v3000_v23 }
  0x5f   :  { %1023 = vmatpush1.bf16.msra.mxu0 %v2971_v57 }
  0x60   :  { %1084 = vmatpush1.bf16.msra.mxu1 %v2976_v39  ;;  %1024 = vmatprep.subr.bf16.mxu0 %v2983_v49  ;;  %v3012_v39 = vld [vmem:[%s3858_s3 + $0x3cc] ss:$16 sps:$4 sm:$0xff]   ;;  %v3019_v49 = vld [vmem:[%s3858_s3 + $0x1c8] ss:$16 sps:$4 sm:$0xff]  }
  0x61   :  { %1085 = vmatprep.subr.bf16.mxu1 %v2988_v51  ;;  %3926 = vst [vmem:[#allocation18_spill] sm:$0xff] %v3012_v39  ;;  %3927 = vst [vmem:[#allocation19_spill] sm:$0xff] %v3019_v49  ;;  %v3024_v51 = vld [vmem:[%s3858_s3 + $0x3c8] ss:$16 sps:$4 sm:$0xff]  }
  0x62   :  { %3928 = vst [vmem:[#allocation20_spill] sm:$0xff] %v3024_v51 }
  0x63   :  { %1025 = vmatpush2.bf16.msra.mxu0 %v2995_v61  ;;  %v3031_v61 = vld [vmem:[%s3858_s3 + $0x1ac] ss:$16 sps:$4 sm:$0xff]  }
  0x64   :  { %1086 = vmatpush2.bf16.msra.mxu1 %v3000_v23  ;;  %1026 = vmatprep.subr.bf16.mxu0 %v3007_v35  ;;  %3929 = vst [vmem:[#allocation21_spill] sm:$0xff] %v3031_v61  ;;  %v3036_v23 = vld [vmem:[%s3858_s3 + $0x3ac] ss:$16 sps:$4 sm:$0xff]   ;;  %v3043_v35 = vld [vmem:[%s3858_s3 + $0x1a8] ss:$16 sps:$4 sm:$0xff]  }
  0x65   :  { %1087 = vmatprep.subr.bf16.mxu1 %v3012_v39  ;;  %3930 = vst [vmem:[#allocation22_spill] sm:$0xff] %v3036_v23  ;;  %3931 = vst [vmem:[#allocation23_spill] sm:$0xff] %v3043_v35  ;;  %v3048_v39 = vld [vmem:[%s3858_s3 + $0x3a8] ss:$16 sps:$4 sm:$0xff]  }
  0x66   :  { %3932 = vst [vmem:[#allocation24_spill] sm:$0xff] %v3048_v39 }
  0x67   :  { %1027 = vmatpush2.bf16.msra.mxu0 %v3019_v49  ;;  %v3055_v49 = vld [vmem:[%s3858_s3 + $0x18c] ss:$16 sps:$4 sm:$0xff]  }
  0x68   :  { %1088 = vmatpush2.bf16.msra.mxu1 %v3024_v51  ;;  %1028 = vmatprep.subr.bf16.mxu0 %v3031_v61  ;;  %3933 = vst [vmem:[#allocation25_spill] sm:$0xff] %v3055_v49  ;;  %v3060_v51 = vld [vmem:[%s3858_s3 + $0x38c] ss:$16 sps:$4 sm:$0xff]   ;;  %v3067_v61 = vld [vmem:[%s3858_s3 + $0x188] ss:$16 sps:$4 sm:$0xff]  }
  0x69   :  { %1089 = vmatprep.subr.bf16.mxu1 %v3036_v23  ;;  %3934 = vst [vmem:[#allocation26_spill] sm:$0xff] %v3060_v51  ;;  %3935 = vst [vmem:[#allocation27_spill] sm:$0xff] %v3067_v61  ;;  %v3072_v23 = vld [vmem:[%s3858_s3 + $0x388] ss:$16 sps:$4 sm:$0xff]  }
  0x6a   :  { %3936 = vst [vmem:[#allocation28_spill] sm:$0xff] %v3072_v23 }
  0x6b   :  { %1029 = vmatpush2.bf16.msra.mxu0 %v3043_v35  ;;  %v3079_v35 = vld [vmem:[%s3858_s3 + $0x16c] ss:$16 sps:$4 sm:$0xff]  }
  0x6c   :  { %1090 = vmatpush2.bf16.msra.mxu1 %v3048_v39  ;;  %1030 = vmatprep.subr.bf16.mxu0 %v3055_v49  ;;  %3937 = vst [vmem:[#allocation29_spill] sm:$0xff] %v3079_v35  ;;  %v3084_v39 = vld [vmem:[%s3858_s3 + $0x36c] ss:$16 sps:$4 sm:$0xff]   ;;  %v3091_v49 = vld [vmem:[%s3858_s3 + $0x168] ss:$16 sps:$4 sm:$0xff]  }
  0x6d   :  { %1091 = vmatprep.subr.bf16.mxu1 %v3060_v51  ;;  %3938 = vst [vmem:[#allocation30_spill] sm:$0xff] %v3084_v39  ;;  %3939 = vst [vmem:[#allocation31_spill] sm:$0xff] %v3091_v49  ;;  %v3096_v51 = vld [vmem:[%s3858_s3 + $0x368] ss:$16 sps:$4 sm:$0xff]  }
  0x6e   :  { %3940 = vst [vmem:[#allocation32_spill] sm:$0xff] %v3096_v51 }
  0x6f   :  { %1031 = vmatpush2.bf16.msra.mxu0 %v3067_v61  ;;  %v3103_v61 = vld [vmem:[%s3858_s3 + $0x14c] ss:$16 sps:$4 sm:$0xff]  }
  0x70   :  { %1092 = vmatpush2.bf16.msra.mxu1 %v3072_v23  ;;  %1032 = vmatprep.subr.bf16.mxu0 %v3079_v35  ;;  %3941 = vst [vmem:[#allocation33_spill] sm:$0xff] %v3103_v61  ;;  %v3108_v23 = vld [vmem:[%s3858_s3 + $0x34c] ss:$16 sps:$4 sm:$0xff]   ;;  %v3115_v35 = vld [vmem:[%s3858_s3 + $0x148] ss:$16 sps:$4 sm:$0xff]  }
  0x71   :  { %1093 = vmatprep.subr.bf16.mxu1 %v3084_v39  ;;  %3942 = vst [vmem:[#allocation34_spill] sm:$0xff] %v3108_v23  ;;  %3943 = vst [vmem:[#allocation35_spill] sm:$0xff] %v3115_v35  ;;  %v3120_v39 = vld [vmem:[%s3858_s3 + $0x348] ss:$16 sps:$4 sm:$0xff]  }
  0x72   :  { %3944 = vst [vmem:[#allocation36_spill] sm:$0xff] %v3120_v39 }
  0x73   :  { %1033 = vmatpush2.bf16.msra.mxu0 %v3091_v49  ;;  %v3127_v49 = vld [vmem:[%s3858_s3 + $0x12c] ss:$16 sps:$4 sm:$0xff]  }
  0x74   :  { %1094 = vmatpush2.bf16.msra.mxu1 %v3096_v51  ;;  %1034 = vmatprep.subr.bf16.mxu0 %v3103_v61  ;;  %3945 = vst [vmem:[#allocation37_spill] sm:$0xff] %v3127_v49  ;;  %v3132_v51 = vld [vmem:[%s3858_s3 + $0x32c] ss:$16 sps:$4 sm:$0xff]   ;;  %v3139_v61 = vld [vmem:[%s3858_s3 + $0x128] ss:$16 sps:$4 sm:$0xff]  }
  0x75   :  { %1095 = vmatprep.subr.bf16.mxu1 %v3108_v23  ;;  %3946 = vst [vmem:[#allocation38_spill] sm:$0xff] %v3132_v51  ;;  %v3144_v23 = vld [vmem:[%s3858_s3 + $0x328] ss:$16 sps:$4 sm:$0xff]  }
  0x76   :  { %3947 = vst [vmem:[#allocation39_spill] sm:$0xff] %v3144_v23 }
  0x77   :  { %1035 = vmatpush2.bf16.msra.mxu0 %v3115_v35  ;;  %v3151_v35 = vld [vmem:[%s3858_s3 + $0x10c] ss:$16 sps:$4 sm:$0xff]  }
  0x78   :  { %1096 = vmatpush2.bf16.msra.mxu1 %v3120_v39  ;;  %1036 = vmatprep.subr.bf16.mxu0 %v3127_v49  ;;  %v3156_v39 = vld [vmem:[%s3858_s3 + $0x30c] ss:$16 sps:$4 sm:$0xff]   ;;  %v3163_v49 = vld [vmem:[%s3858_s3 + $0x108] ss:$16 sps:$4 sm:$0xff]  }
  0x79   :  { %1097 = vmatprep.subr.bf16.mxu1 %v3132_v51  ;;  %3948 = vst [vmem:[#allocation40_spill] sm:$0xff] %v3156_v39  ;;  %v3168_v51 = vld [vmem:[%s3858_s3 + $0x308] ss:$16 sps:$4 sm:$0xff]  }
  0x7a   :  { %3949 = vst [vmem:[#allocation41_spill] sm:$0xff] %v3168_v51 }
  0x7b   :  { %1037 = vmatpush2.bf16.msra.mxu0 %v3139_v61 }
  0x7c   :  { %1098 = vmatpush2.bf16.msra.mxu1 %v3144_v23  ;;  %1038 = vmatprep.subr.bf16.mxu0 %v3151_v35 }
  0x7d   :  { %1099 = vmatprep.subr.bf16.mxu1 %v3156_v39 }
  0x7f   :  { %1039 = vmatpush2.bf16.msra.mxu0 %v3163_v49 }
  0x80   :  { %1100 = vmatpush2.bf16.msra.mxu1 %v3168_v51 }
  0x81   :  { %1360 = vmatprep.subr.bf16.mxu1 %v2455_v0  ;;  %v3190_v0 = vld [vmem:[%s3860_s4 + $0xf8] sm:$0xff] }
  0x82   :  { %1041 = vmatmul.mubr.bf16.vlgmr.msra.gmra.mxu0 %v2762_v9  ;;  %2026 = vmatprep.subr.mxu0 %v3190_v0  ;;  %v3270_v9 = vld [vmem:[%s3860_s4 + $0xc8] sm:$0xff] }
  0x83   :  { %1102 = vmatmul.mubr.bf16.vlgmr.msra.gmra.mxu1 %v2767_v11  ;;  %1050 = vmatprep.mubr.bf16.mxu0 %v2850_v45  ;;  %v3283_v11 = vld [vmem:[%s3860_s4 + $0xc0] sm:$0xff] }
  0x84   :  { %1111 = vmatprep.mubr.bf16.mxu1 %v2856_v47  ;;  %1361 = vmatpush1.bf16.msra.mxu1 %v2464_v2  ;;  %v3199_v2 = vld [vmem:[%s3860_s4 + $0x78] sm:$0xff]  ;;  %v3290_v45 = vld [vmem:[%s3860_s4 + $0x40] sm:$0xff]  ;;  %v3309_v47 = vld [vmem:[%s3860_s4 + $0xb0] sm:$0xff] }
  0x85   :  { %1362 = vmatprep.subr.bf16.mxu1 %v2472_v4  ;;  %v3204_v4 = vld [vmem:[%s3860_s4 + $0xf0] sm:$0xff]  ;;  %2027 = vmatpush3.msra.mxu0 %v3199_v2 }
  0x86   :  { %2028 = vmatprep.subr.mxu0 %v3204_v4 }
  0x88   :  { %1363 = vmatpush1.bf16.msra.mxu1 %v2481_v6  ;;  %v3213_v6 = vld [vmem:[%s3860_s4 + $0x70] sm:$0xff] }
  0x89   :  { %1364 = vmatprep.subr.bf16.mxu1 %v2490_v8  ;;  %v3218_v8 = vld [vmem:[%s3860_s4 + $0xe8] sm:$0xff]  ;;  %2029 = vmatpush3.msra.mxu0 %v3213_v6 }
  0x8a   :  { %1051 = vmatmul.mubr.bf16.gmra.mxu0 %v2861_v50  ;;  %2030 = vmatprep.subr.mxu0 %v3218_v8  ;;  %v3316_v50 = vld [vmem:[%s3860_s4 + $0x30] sm:$0xff] }
  0x8b   :  { %1112 = vmatmul.mubr.bf16.gmra.mxu1 %v2868_v53  ;;  %1060 = vmatprep.mubr.bf16.mxu0 %v2901_v3  ;;  %v3335_v53 = vld [vmem:[%s3860_s4 + $0xa0] sm:$0xff] }
  0x8c   :  { %1121 = vmatprep.mubr.bf16.mxu1 %v2920_v27  ;;  %1365 = vmatpush1.bf16.msra.mxu1 %v2498_v10  ;;  %v3226_v10 = vld [vmem:[%s3860_s4 + $0x68] sm:$0xff] }
  0x8d   :  { %1366 = vmatprep.subr.bf16.mxu1 %v2507_v12  ;;  %v3231_v12 = vld [vmem:[%s3860_s4 + $0xe0] sm:$0xff]  ;;  %2031 = vmatpush3.msra.mxu0 %v3226_v10 }
  0x8e   :  { %2032 = vmatprep.subr.mxu0 %v3231_v12 }
  0x90   :  { %1367 = vmatpush1.bf16.msra.mxu1 %v2516_v14  ;;  %v3239_v14 = vld [vmem:[%s3860_s4 + $0x60] sm:$0xff] }
  0x91   :  { %1368 = vmatprep.subr.bf16.mxu1 %v2525_v16  ;;  %v3244_v16 = vld [vmem:[%s3860_s4 + $0xd8] sm:$0xff]  ;;  %2033 = vmatpush3.msra.mxu0 %v3239_v14 }
  0x92   :  { %1061 = vmatmul.mubr.bf16.gmra.mxu0 %v2906_v15  ;;  %2034 = vmatprep.subr.mxu0 %v3244_v16 }
  0x93   :  { %1122 = vmatmul.mubr.bf16.gmra.mxu1 %v2922_v31 }
  0x94   :  { %1369 = vmatpush1.bf16.msra.mxu1 %v2534_v18  ;;  %v3252_v18 = vld [vmem:[%s3860_s4 + $0x58] sm:$0xff] }
  0x95   :  { %1370 = vmatprep.subr.bf16.mxu1 %v2543_v20  ;;  %v3257_v20 = vld [vmem:[%s3860_s4 + $0xd0] sm:$0xff]  ;;  %2035 = vmatpush3.msra.mxu0 %v3252_v18 }
  0x96   :  { %2036 = vmatprep.subr.mxu0 %v3257_v20 }
  0x98   :  { %1371 = vmatpush1.bf16.msra.mxu1 %v2552_v22  ;;  %v3265_v22 = vld [vmem:[%s3860_s4 + $0x50] sm:$0xff] }
  0x99   :  { %1372 = vmatprep.subr.bf16.mxu1 %v2561_v24  ;;  %v3276_v24 = vld [vmem:[%s3860_s4 + $0x48] sm:$0xff]  ;;  %2037 = vmatpush3.msra.mxu0 %v3265_v22 }
  0x9a   :  { %2038 = vmatprep.subr.mxu0 %v3270_v9 }
  0x9b   :  { %2039 = vmatpush3.msra.mxu0 %v3276_v24 }
  0x9c   :  { %1373 = vmatpush1.bf16.msra.mxu1 %v2570_v26  ;;  %v3296_v26 = vld [vmem:[%s3860_s4 + $0xb8] sm:$0xff]  ;;  %2040 = vmatprep.subr.mxu0 %v3283_v11 }
  0x9d   :  { %1374 = vmatprep.subr.bf16.mxu1 %v2579_v28  ;;  %v3302_v28 = vld [vmem:[%s3860_s4 + $0x38] sm:$0xff]  ;;  %2041 = vmatpush3.msra.mxu0 %v3290_v45 }
  0x9e   :  { %2042 = vmatprep.subr.mxu0 %v3296_v26 }
  0x9f   :  { %2043 = vmatpush3.msra.mxu0 %v3302_v28 }
  0xa0   :  { %1375 = vmatpush1.bf16.msra.mxu1 %v2588_v30  ;;  %v3322_v30 = vld [vmem:[%s3860_s4 + $0xa8] sm:$0xff]  ;;  %2044 = vmatprep.subr.mxu0 %v3309_v47 }
  0xa1   :  { %1376 = vmatprep.subr.bf16.mxu1 %v2597_v32  ;;  %v3328_v32 = vld [vmem:[%s3860_s4 + $0x28] sm:$0xff]  ;;  %2045 = vmatpush3.msra.mxu0 %v3316_v50 }
  0xa2   :  { %2046 = vmatprep.subr.mxu0 %v3322_v30 }
  0xa3   :  { %2047 = vmatpush3.msra.mxu0 %v3328_v32 }
  0xa4   :  { %1377 = vmatpush2.bf16.msra.mxu1 %v2606_v34  ;;  %2048 = vmatprep.subr.mxu0 %v3335_v53  ;;  %v3357_v34 = vld [vmem:[%s3860_s4 + $0x20] sm:$0xff] }
  0xa5   :  { %1378 = vmatprep.subr.bf16.mxu1 %v2615_v36  ;;  %2049 = vmatpush3.msra.mxu0 %v3357_v34  ;;  %v3364_v36 = vld [vmem:[%s3860_s4 + $0x98] sm:$0xff] }
  0xa6   :  { %3950 = vst [vmem:[#allocation42_spill] sm:$0xff] %v3364_v36  ;;  %2050 = vmatprep.subr.mxu0 %v3364_v36 }
  0xa8   :  { %1379 = vmatpush2.bf16.msra.mxu1 %v2624_v38  ;;  %v3370_v38 = vld [vmem:[%s3860_s4 + $0x18] sm:$0xff] }
  0xa9   :  { %1380 = vmatprep.subr.bf16.mxu1 %v2633_v40  ;;  %3951 = vst [vmem:[#allocation43_spill] sm:$0xff] %v3370_v38  ;;  %2051 = vmatpush3.msra.mxu0 %v3370_v38  ;;  %v3376_v40 = vld [vmem:[%s3860_s4 + $0x90] sm:$0xff] }
  0xaa   :  { %3952 = vst [vmem:[#allocation44_spill] sm:$0xff] %v3376_v40  ;;  %2052 = vmatprep.subr.mxu0 %v3376_v40 }
  0xac   :  { %1381 = vmatpush2.bf16.msra.mxu1 %v2642_v42  ;;  %v3382_v42 = vld [vmem:[%s3860_s4 + $0x10] sm:$0xff] }
  0xad   :  { %1382 = vmatprep.subr.bf16.mxu1 %v2651_v44  ;;  %3953 = vst [vmem:[#allocation45_spill] sm:$0xff] %v3382_v42  ;;  %2053 = vmatpush3.msra.mxu0 %v3382_v42  ;;  %v3388_v44 = vld [vmem:[%s3860_s4 + $0x88] sm:$0xff] }
  0xae   :  { %3954 = vst [vmem:[#allocation46_spill] sm:$0xff] %v3388_v44  ;;  %2054 = vmatprep.subr.mxu0 %v3388_v44 }
  0xb0   :  { %1383 = vmatpush2.bf16.msra.mxu1 %v2660_v46  ;;  %v3394_v46 = vld [vmem:[%s3860_s4 + $0x8] sm:$0xff] }
  0xb1   :  { %1384 = vmatprep.subr.bf16.mxu1 %v2668_v48  ;;  %3955 = vst [vmem:[#allocation47_spill] sm:$0xff] %v3394_v46  ;;  %2055 = vmatpush3.msra.mxu0 %v3394_v46  ;;  %v3400_v48 = vld [vmem:[%s3860_s4 + $0x80] sm:$0xff] }
  0xb2   :  { %3956 = vst [vmem:[#allocation48_spill] sm:$0xff] %v3400_v48  ;;  %2056 = vmatprep.subr.mxu0 %v3400_v48 }
  0xb4   :  { %1385 = vmatpush2.bf16.msra.mxu1 %v2689_v52  ;;  %v3406_v52 = vld [vmem:[%s3860_s4] sm:$0xff] }
  0xb5   :  { %1386 = vmatprep.subr.bf16.mxu1 %v2699_v54  ;;  %3957 = vst [vmem:[#allocation49_spill] sm:$0xff] %v3406_v52  ;;  %2057 = vmatpush3.msra.mxu0 %v3406_v52  ;;  %v2384_v54 = vld [vmem:[%s3858_s3 + $0x2e4] ss:$16 sps:$4 sm:$0xff]  }
  0xb6   :  { %1421 = vmatprep.subr.bf16.mxu0 %v2384_v54 }
  0xb8   :  { %1387 = vmatpush2.bf16.msra.mxu1 %v2708_v56 }
  0xb9   :  { %1388 = vmatprep.subr.bf16.mxu1 %v2717_v58 }
  0xbc   :  { %1389 = vmatpush2.bf16.msra.mxu1 %v2726_v60 }
  0xbd   :  { %1390 = vmatprep.subr.bf16.mxu1 %v2735_v62 }
  0xc0   :  { %1391 = vmatpush2.bf16.msra.mxu1 %v2744_v1  ;;  %v2330_v1 = vld [vmem:[%s3861_s2 + $0x4] ss:$16 sps:$4 sm:$0xff]  }
  0xc1   :  { %1482 = vmatprep.subr.bf16.mxu1 %v2753_v5  ;;  %v3426_v5 = vld [vmem:[%s3861_s2] ss:$16 sps:$4 sm:$0xff]   ;;  %1392 = vmatprep.mubr.bf16.mxu1 %v2330_v1 }
  0xc3   :  { %1393 = vmatmul.mubr.bf16.vlgmr.msra.gmra.mxu1 %v3426_v5 }
  0xc4   :  { %1483 = vmatpush1.bf16.msra.mxu1 %v2772_v13 }
  0xc5   :  { %1484 = vmatprep.subr.bf16.mxu1 %v2781_v17 }
  0xc8   :  { %1485 = vmatpush1.bf16.msra.mxu1 %v2792_v21 }
  0xc9   :  { %1486 = vmatprep.subr.bf16.mxu1 %v2801_v25 }
  0xcc   :  { %1487 = vmatpush1.bf16.msra.mxu1 %v2810_v29 }
  0xcd   :  { %1488 = vmatprep.subr.bf16.mxu1 %v2819_v33 }
  0xd0   :  { %1489 = vmatpush1.bf16.msra.mxu1 %v2830_v37  ;;  %v3958_v37 = vld [vmem:[#allocation13_spill] sm:$0xff] }
  0xd1   :  { %1490 = vmatprep.subr.bf16.mxu1 %v2840_v41  ;;  %v3959_v41 = vld [vmem:[#allocation15_spill] sm:$0xff] }
  0xd4   :  { %1491 = vmatpush1.bf16.msra.mxu1 %v2875_v55  ;;  %v3960_v55 = vld [vmem:[#allocation17_spill] sm:$0xff] }
  0xd5   :  { %1492 = vmatprep.subr.bf16.mxu1 %v2889_v59  ;;  %v3961_v59 = vld [vmem:[#allocation19_spill] sm:$0xff] }
  0xd8   :  { %1493 = vmatpush1.bf16.msra.mxu1 %v2913_v19  ;;  %v3964_v19 = vld [vmem:[#allocation25_spill] sm:$0xff] }
  0xd9   :  { %1494 = vmatprep.subr.bf16.mxu1 %v2929_v63  ;;  %v3965_v63 = vld [vmem:[#allocation27_spill] sm:$0xff] }
  0xdc   :  { %1495 = vmatpush1.bf16.msra.mxu1 %v2945_v7  ;;  %v3966_v7 = vld [vmem:[#allocation29_spill] sm:$0xff] }
  0xdd   :  { %1496 = vmatprep.subr.bf16.mxu1 %v2957_v43  ;;  %v2334_v43 = vld [vmem:[%s3861_s2 + $0x24] ss:$16 sps:$4 sm:$0xff]  }
  0xde   :  { %1402 = vmatprep.mubr.bf16.mxu1 %v2334_v43 }
  0xe0   :  { %1497 = vmatpush1.bf16.msra.mxu1 %v2971_v57  ;;  %v3490_v57 = vld [vmem:[%s3861_s2 + $0x20] ss:$16 sps:$4 sm:$0xff]  }
  0xe1   :  { %1498 = vmatprep.subr.bf16.mxu1 %v3958_v37  ;;  %1403 = vmatmul.mubr.bf16.gmra.mxu1 %v3490_v57  ;;  %v1304_v37 = vld [vmem:[%s3861_s2 + $0x40] sm:$0xff] }
  0xe4   :  { %1499 = vmatpush2.bf16.msra.mxu1 %v3959_v41  ;;  %v3499_v41 = vcombine.high %v1304_v37, %v1304_v37 }
  0xe5   :  { %1500 = vmatprep.subr.bf16.mxu1 %v3960_v55  ;;  %v3969_v55 = vld [vmem:[#allocation35_spill] sm:$0xff] }
  0xe6   :  { %1412 = vmatprep.mubr.bf16.mxu1 %v3499_v41 }
  0xe8   :  { %1501 = vmatpush2.bf16.msra.mxu1 %v3961_v59  ;;  %v3502_v59 = vcombine.low %v1304_v37, %v1304_v37 }
  0xea   :  { %1413 = vmatmul.mubr.bf16.gmra.mxu1 %v3502_v59 }
  0xeb   :  { %1514 = vmatprep.mubr.bf16.mxu1 %v2330_v1 }
 0x102   :  { %v3412_v56 = vpop.f32.mrf.mxu0 }
 0x103   :  { %v3414_v58 = vpop.f32.mrf.mxu1 }
 0x104   :  { %v3416_v60 = vpop.f32.mrf.mxu0 }
 0x105   :  { %v3418_v62 = vpop.f32.mrf.mxu1 }
 0x106   :  { %v3429_v3 = vpop.f32.mrf.mxu0 }
 0x107   :  { %v3431_v15 = vpop.f32.mrf.mxu1 }
 0x108   :  { %v3435_v27 = vpop.f32.mrf.mxu0 }
 0x109   :  { %v3437_v31 = vpop.f32.mrf.mxu1 }
 0x10a   :  { %v3441_v54 = vpop.f32.mrf.mxu0 }
 0x10b   :  { %v3443_v51 = vpop.f32.mrf.mxu1 }
 0x10c   :  { %v3445_v39 = vpop.f32.mrf.mxu0 }
 0x10d   :  { %v3447_v23 = vpop.f32.mrf.mxu1 }
 0x10e   :  { %v3451_v13 = vpop.f32.mrf.mxu0 }
 0x10f   :  { %v3453_v17 = vpop.f32.mrf.mxu1 }
 0x110   :  { %v3455_v52 = vpop.f32.mrf.mxu0 }
 0x111   :  { %v3457_v21 = vpop.f32.mrf.mxu1 }
 0x112   :  { %v3461_v25 = vpop.f32.mrf.mxu0 }
 0x113   :  { %v3463_v48 = vpop.f32.mrf.mxu1 }
 0x114   :  { %v3465_v46 = vpop.f32.mrf.mxu0 }
 0x115   :  { %v3467_v29 = vpop.f32.mrf.mxu1 }
 0x116   :  { %v944_v33 = vpop.f32.mrf.mxu0 }
 0x117   :  { %v1005_v44 = vpop.f32.mrf.mxu1  ;;  %v3968_v33 = vld [vmem:[#allocation33_spill] sm:$0xff] }
 0x118   :  { %v945_v42 = vpop.f32.mrf.mxu0  ;;  %v3967_v44 = vld [vmem:[#allocation31_spill] sm:$0xff] }
 0x119   :  { %v1006_v40 = vpop.f32.mrf.mxu1  ;;  %v3962_v42 = vld [vmem:[#allocation21_spill] sm:$0xff] }
 0x11a   :  { %1502 = vmatprep.subr.bf16.mxu1 %v3962_v42  ;;  %v3963_v40 = vld [vmem:[#allocation23_spill] sm:$0xff]  ;;  %v3970_v42 = vld [vmem:[#allocation37_spill] sm:$0xff] }
 0x11b   :  { %1503 = vmatpush2.bf16.msra.mxu1 %v3963_v40 }
 0x11c   :  { %1504 = vmatprep.subr.bf16.mxu1 %v3964_v19 }
 0x11f   :  { %1505 = vmatpush2.bf16.msra.mxu1 %v3965_v63  ;;  %v984_v63 = vadd.f32 %v3418_v62, %v3416_v60 }
 0x120   :  { %1506 = vmatprep.subr.bf16.mxu1 %v3966_v7 }
 0x121   :  { %v1131_v38 = vmul.f32 %v984_v63, %v984_v63 }
 0x123   :  { %1507 = vmatpush2.bf16.msra.mxu1 %v3967_v44  ;;  %v982_v44 = vadd.f32 %v3414_v58, %v3412_v56  ;;  %v986_v56 = vadd.f32 %v3431_v15, %v3429_v3 }
 0x124   :  { %1508 = vmatprep.subr.bf16.mxu1 %v3968_v33 }
 0x125   :  { %v1130_v62 = vmul.f32 %v982_v44, %v982_v44 }
 0x127   :  { %1509 = vmatpush2.bf16.msra.mxu1 %v3969_v55 }
 0x128   :  { %1510 = vmatprep.subr.bf16.mxu1 %v3970_v42 }
 0x12b   :  { %1511 = vmatpush2.bf16.msra.mxu1 %v3139_v61  ;;  %v988_v61 = vadd.f32 %v3437_v31, %v3435_v27 }
 0x12c   :  { %1512 = vmatprep.subr.bf16.mxu1 %v3151_v35 }
 0x12d   :  { %v1133_v27 = vmul.f32 %v988_v61, %v988_v61 }
 0x12f   :  { %1513 = vmatpush2.bf16.msra.mxu1 %v3163_v49 }
 0x130   :  { %2073 = vmatprep.subr.mxu1 %v3190_v0 }
 0x132   :  { %1515 = vmatmul.mubr.bf16.vlgmr.msra.gmra.mxu1 %v3426_v5  ;;  %v994_v5 = vadd.f32 %v3447_v23, %v3445_v39  ;;  %v2385_v39 = vld [vmem:[%s3858_s3 + $0x2e0] ss:$16 sps:$4 sm:$0xff]   ;;  %v998_v23 = vadd.f32 %v3457_v21, %v3455_v52  ;;  %v996_v52 = vadd.f32 %v3453_v17, %v3451_v13  ;;  %v2388_v13 = vld [vmem:[%s3858_s3 + $0x2a4] ss:$16 sps:$4 sm:$0xff]   ;;  %v1004_v17 = vadd.f32 %v3467_v29, %v3465_v46 }
 0x133   :  { %1524 = vmatprep.mubr.bf16.mxu1 %v2334_v43  ;;  %2074 = vmatpush3.msra.mxu1 %v3199_v2  ;;  %v1132_v2 = vmul.f32 %v986_v56, %v986_v56 }
 0x134   :  { %2075 = vmatprep.subr.mxu1 %v3204_v4 }
 0x135   :  { %2076 = vmatpush3.msra.mxu1 %v3213_v6 }
 0x136   :  { %2077 = vmatprep.subr.mxu1 %v3218_v8 }
 0x137   :  { %2078 = vmatpush3.msra.mxu1 %v3226_v10  ;;  %v2386_v10 = vld [vmem:[%s3858_s3 + $0x2c4] ss:$16 sps:$4 sm:$0xff]  }
 0x138   :  { %2079 = vmatprep.subr.mxu1 %v3231_v12 }
 0x139   :  { %2080 = vmatpush3.msra.mxu1 %v3239_v14  ;;  %v2387_v14 = vld [vmem:[%s3858_s3 + $0x2c0] ss:$16 sps:$4 sm:$0xff]  }
 0x13a   :  { %1525 = vmatmul.mubr.bf16.gmra.mxu1 %v3490_v57  ;;  %2081 = vmatprep.subr.mxu1 %v3244_v16  ;;  %v1136_v16 = vmul.f32 %v996_v52, %v996_v52  ;;  %v2412_v52 = vld [vmem:[%s3858_s3 + $0x324] ss:$16 sps:$4 sm:$0xff]  }
 0x13b   :  { %1534 = vmatprep.mubr.bf16.mxu1 %v3499_v41  ;;  %2082 = vmatpush3.msra.mxu1 %v3252_v18  ;;  %v2389_v18 = vld [vmem:[%s3858_s3 + $0x2a0] ss:$16 sps:$4 sm:$0xff]  }
 0x13c   :  { %2083 = vmatprep.subr.mxu1 %v3257_v20 }
 0x13d   :  { %2084 = vmatpush3.msra.mxu1 %v3265_v22  ;;  %v1139_v22 = vmul.f32 %v1004_v17, %v1004_v17 }
 0x13e   :  { %2085 = vmatprep.subr.mxu1 %v3270_v9 }
 0x13f   :  { %2086 = vmatpush3.msra.mxu1 %v3276_v24  ;;  %v3573_v24 = vld [vmem:[%s3861_s2 + $0xc] ss:$16 sps:$4 sm:$0xff]  }
 0x140   :  { %2087 = vmatprep.subr.mxu1 %v3283_v11  ;;  %v2393_v11 = vld [vmem:[%s3858_s3 + $0x260] ss:$16 sps:$4 sm:$0xff]  }
 0x141   :  { %2088 = vmatpush3.msra.mxu1 %v3290_v45  ;;  %v2394_v45 = vld [vmem:[%s3858_s3 + $0x244] ss:$16 sps:$4 sm:$0xff]  }
 0x142   :  { %v1042_v40 = vpop.f32.mrf.mxu0  ;;  %1535 = vmatmul.mubr.bf16.gmra.mxu1 %v3502_v59  ;;  %2089 = vmatprep.subr.mxu1 %v3296_v26  ;;  %v2395_v26 = vld [vmem:[%s3858_s3 + $0x240] ss:$16 sps:$4 sm:$0xff]  }
 0x143   :  { %v1103_v19 = vpop.f32.mrf.mxu1  ;;  %2090 = vmatpush3.msra.mxu1 %v3302_v28  ;;  %v2396_v28 = vld [vmem:[%s3858_s3 + $0x224] ss:$16 sps:$4 sm:$0xff]  }
 0x144   :  { %v1104_v7 = vadd.f32 %v1103_v19, %v1042_v40  ;;  %v1044_v33 = vpop.f32.mrf.mxu0  ;;  %2091 = vmatprep.subr.mxu1 %v3309_v47  ;;  %v3971_v47 = vld [vmem:[#allocation42_spill] sm:$0xff] }
 0x145   :  { %v1105_v37 = vpop.f32.mrf.mxu1  ;;  %2092 = vmatpush3.msra.mxu1 %v3316_v50  ;;  %v3972_v50 = vld [vmem:[#allocation43_spill] sm:$0xff] }
 0x146   :  { %v1106_v55 = vadd.f32 %v1105_v37, %v1044_v33  ;;  %v1140_v35 = vmul.f32 %v1104_v7, %v1104_v7  ;;  %v1046_v1 = vpop.f32.mrf.mxu0  ;;  %v1135_v33 = vmul.f32 %v994_v5, %v994_v5  ;;  %2093 = vmatprep.subr.mxu1 %v3322_v30  ;;  %v2397_v30 = vld [vmem:[%s3858_s3 + $0x220] ss:$16 sps:$4 sm:$0xff]  }
 0x147   :  { %v1107_v42 = vpop.f32.mrf.mxu1  ;;  %2094 = vmatpush3.msra.mxu1 %v3328_v32  ;;  %v3973_v32 = vld [vmem:[#allocation44_spill] sm:$0xff] }
 0x148   :  { %v1141_v36 = vmul.f32 %v1106_v55, %v1106_v55  ;;  %v1108_v60 = vadd.f32 %v1107_v42, %v1046_v1  ;;  %v1048_v58 = vpop.f32.mrf.mxu0  ;;  %v1150_v31 = vadd.f32 %v1140_v35, %v1130_v62  ;;  %v1137_v42 = vmul.f32 %v998_v23, %v998_v23  ;;  %2095 = vmatprep.subr.mxu1 %v3335_v53  ;;  %v2398_v53 = vld [vmem:[%s3858_s3 + $0x204] ss:$16 sps:$4 sm:$0xff]  }
 0x149   :  { %v1109_v49 = vpop.f32.mrf.mxu1  ;;  %2096 = vmatpush3.msra.mxu1 %v3357_v34  ;;  %v3976_v34 = vld [vmem:[#allocation47_spill] sm:$0xff] }
 0x14a   :  { %v1151_v0 = vadd.f32 %v1141_v36, %v1131_v38  ;;  %v1110_v40 = vadd.f32 %v1109_v49, %v1048_v58  ;;  %v1142_v19 = vmul.f32 %v1108_v60, %v1108_v60  ;;  %v1052_v63 = vpop.f32.mrf.mxu0  ;;  %v992_v36 = vadd.f32 %v3443_v51, %v3441_v54  ;;  %2097 = vmatprep.subr.mxu1 %v3971_v47  ;;  %v2402_v23 = vld [vmem:[%s3858_s3 + $0x3c4] ss:$16 sps:$4 sm:$0xff]  }
 0x14b   :  { %v1113_v7 = vpop.f32.mrf.mxu1  ;;  %v1002_v49 = vadd.f32 %v3463_v48, %v3461_v25  ;;  %v2390_v48 = vld [vmem:[%s3858_s3 + $0x284] ss:$16 sps:$4 sm:$0xff]   ;;  %2098 = vmatpush3.msra.mxu1 %v3972_v50 }
 0x14c   :  { %v1143_v3 = vmul.f32 %v1110_v40, %v1110_v40  ;;  %v1114_v15 = vadd.f32 %v1113_v7, %v1052_v63  ;;  %1224 = vmatprep.mubr.f32.mxu0 %v1151_v0  ;;  %v1054_v4 = vpop.f32.mrf.mxu0  ;;  %v1152_v6 = vadd.f32 %v1142_v19, %v1132_v2  ;;  %v1134_v12 = vmul.f32 %v992_v36, %v992_v36  ;;  %v3974_v2 = vld [vmem:[#allocation45_spill] sm:$0xff]  ;;  %v3975_v36 = vld [vmem:[#allocation46_spill] sm:$0xff] }
 0x14d   :  { %v1115_v38 = vpop.f32.mrf.mxu1  ;;  %1225 = vmatmul.mubr.f32.vlgmr.msra.gmra.mxu0 %v1150_v31  ;;  %v1138_v63 = vmul.f32 %v1002_v49, %v1002_v49  ;;  %2099 = vmatprep.subr.mxu1 %v3973_v32  ;;  %v4004_v47 = vld [vmem:[#allocation41_spill] sm:$0xff] }
 0x14e   :  { %v1153_v43 = vadd.f32 %v1143_v3, %v1133_v27  ;;  %v1116_v44 = vadd.f32 %v1115_v38, %v1054_v4  ;;  %1422 = vmatpush1.bf16.msra.mxu0 %v2385_v39  ;;  %v1144_v8 = vmul.f32 %v1114_v15, %v1114_v15  ;;  %v1056_v51 = vpop.f32.mrf.mxu0  ;;  %v2391_v3 = vld [vmem:[%s3858_s3 + $0x280] ss:$16 sps:$4 sm:$0xff]   ;;  %v2392_v15 = vld [vmem:[%s3858_s3 + $0x264] ss:$16 sps:$4 sm:$0xff]   ;;  %2100 = vmatpush3.msra.mxu1 %v3974_v2  ;;  %v3977_v38 = vld [vmem:[#allocation48_spill] sm:$0xff] }
 0x14f   :  { %v1117_v54 = vpop.f32.mrf.mxu1  ;;  %1423 = vmatprep.subr.bf16.mxu0 %v2386_v10  ;;  %2101 = vmatprep.subr.mxu1 %v3975_v36  ;;  %v2399_v4 = vld [vmem:[%s3858_s3 + $0x200] ss:$16 sps:$4 sm:$0xff]  }
 0x150   :  { %v1145_v37 = vmul.f32 %v1116_v44, %v1116_v44  ;;  %v1118_v55 = vadd.f32 %v1117_v54, %v1056_v51  ;;  %1229 = vmatprep.mubr.f32.mxu0 %v1153_v43  ;;  %v1058_v21 = vpop.f32.mrf.mxu0  ;;  %v1154_v57 = vadd.f32 %v1144_v8, %v1134_v12  ;;  %2102 = vmatpush3.msra.mxu1 %v3976_v34  ;;  %v2400_v43 = vld [vmem:[%s3858_s3 + $0x3e4] ss:$16 sps:$4 sm:$0xff]   ;;  %v2401_v39 = vld [vmem:[%s3858_s3 + $0x3e0] ss:$16 sps:$4 sm:$0xff]  }
 0x151   :  { %v1119_v61 = vpop.f32.mrf.mxu1  ;;  %1230 = vmatmul.mubr.f32.gmra.mxu0 %v1152_v6  ;;  %2103 = vmatprep.subr.mxu1 %v3977_v38  ;;  %v3978_v44 = vld [vmem:[#allocation49_spill] sm:$0xff] }
 0x152   :  { %v1155_v35 = vadd.f32 %v1145_v37, %v1135_v33  ;;  %v1120_v1 = vadd.f32 %v1119_v61, %v1058_v21  ;;  %1424 = vmatpush1.bf16.msra.mxu0 %v2387_v14  ;;  %v1146_v60 = vmul.f32 %v1118_v55, %v1118_v55  ;;  %v1062_v62 = vpop.f32.mrf.mxu0  ;;  %2104 = vmatpush3.msra.mxu1 %v3978_v44  ;;  %v2403_v6 = vld [vmem:[%s3858_s3 + $0x3c0] ss:$16 sps:$4 sm:$0xff]   ;;  %v2404_v8 = vld [vmem:[%s3858_s3 + $0x3a4] ss:$16 sps:$4 sm:$0xff]   ;;  %v2336_v14 = vld [vmem:[%s3861_s2 + $0x2c] ss:$16 sps:$4 sm:$0xff]  }
 0x153   :  { %v1123_v56 = vpop.f32.mrf.mxu1  ;;  %1425 = vmatprep.subr.bf16.mxu0 %v2388_v13  ;;  %v2405_v51 = vld [vmem:[%s3858_s3 + $0x3a0] ss:$16 sps:$4 sm:$0xff]   ;;  %v2406_v54 = vld [vmem:[%s3858_s3 + $0x384] ss:$16 sps:$4 sm:$0xff]   ;;  %v2419_v13 = vld [vmem:[%s3858_s3 + $0x2c8] ss:$16 sps:$4 sm:$0xff]  }
 0x154   :  { %v1147_v41 = vmul.f32 %v1120_v1, %v1120_v1  ;;  %v1124_v58 = vadd.f32 %v1123_v56, %v1062_v62  ;;  %1234 = vmatprep.mubr.f32.mxu0 %v1155_v35  ;;  %v1064_v0 = vpop.f32.mrf.mxu0  ;;  %v1156_v46 = vadd.f32 %v1146_v60, %v1136_v16  ;;  %v2407_v10 = vld [vmem:[%s3858_s3 + $0x380] ss:$16 sps:$4 sm:$0xff]   ;;  %v2408_v33 = vld [vmem:[%s3858_s3 + $0x364] ss:$16 sps:$4 sm:$0xff]   ;;  %v2331_v35 = vld [vmem:[%s3861_s2 + $0x8] ss:$16 sps:$4 sm:$0xff]  }
 0x155   :  { %v1125_v40 = vpop.f32.mrf.mxu1  ;;  %1235 = vmatmul.mubr.f32.gmra.mxu0 %v1154_v57  ;;  %v2409_v37 = vld [vmem:[%s3858_s3 + $0x360] ss:$16 sps:$4 sm:$0xff]   ;;  %v2410_v55 = vld [vmem:[%s3858_s3 + $0x344] ss:$16 sps:$4 sm:$0xff]   ;;  %v2417_v57 = vld [vmem:[%s3858_s3 + $0x2e8] ss:$16 sps:$4 sm:$0xff]  }
 0x156   :  { %v1157_v27 = vadd.f32 %v1147_v41, %v1137_v42  ;;  %v1126_v31 = vadd.f32 %v1125_v40, %v1064_v0  ;;  %1426 = vmatpush1.bf16.msra.mxu0 %v2389_v18  ;;  %v1148_v20 = vmul.f32 %v1124_v58, %v1124_v58  ;;  %v1066_v25 = vpop.f32.mrf.mxu0  ;;  %v2411_v12 = vld [vmem:[%s3858_s3 + $0x340] ss:$16 sps:$4 sm:$0xff]   ;;  %v2414_v61 = vld [vmem:[%s3858_s3 + $0x304] ss:$16 sps:$4 sm:$0xff]   ;;  %v2416_v42 = vld [vmem:[%s3858_s3 + $0x2ec] ss:$16 sps:$4 sm:$0xff]  }
 0x157   :  { %1427 = vmatprep.subr.bf16.mxu0 %v2390_v48  ;;  %v1127_v29 = vpop.f32.mrf.mxu1  ;;  %v2413_v21 = vld [vmem:[%s3858_s3 + $0x320] ss:$16 sps:$4 sm:$0xff]   ;;  %v2418_v60 = vld [vmem:[%s3858_s3 + $0x2cc] ss:$16 sps:$4 sm:$0xff]   ;;  %v2339_v56 = vld [vmem:[%s3861_s2 + $0x28] ss:$16 sps:$4 sm:$0xff]  }
 0x158   :  { %v1149_v19 = vmul.f32 %v1126_v31, %v1126_v31  ;;  %1239 = vmatprep.mubr.f32.mxu0 %v1157_v27  ;;  %v1067_v7 = vpop.f32.mrf.mxu0  ;;  %v1158_v59 = vadd.f32 %v1148_v20, %v1138_v63  ;;  %v2415_v1 = vld [vmem:[%s3858_s3 + $0x300] ss:$16 sps:$4 sm:$0xff]   ;;  %v1305_v62 = vld [vmem:[%s3861_s2 + $0x48] sm:$0xff]  ;;  %v3982_v27 = vld [vmem:[#allocation6_spill] sm:$0xff] }
 0x159   :  { %1240 = vmatmul.mubr.f32.gmra.mxu0 %v1156_v46  ;;  %v1128_v9 = vpop.f32.mrf.mxu1  ;;  %v2020_v17 = vcombine.high %v1305_v62, %v1305_v62  ;;  %v2420_v41 = vld [vmem:[%s3858_s3 + $0x2ac] ss:$16 sps:$4 sm:$0xff]   ;;  %v2421_v58 = vld [vmem:[%s3858_s3 + $0x2a8] ss:$16 sps:$4 sm:$0xff]   ;;  %v3979_v16 = vld [vmem:[#allocation3_spill] sm:$0xff]  ;;  %v2019_v49 = vcombine.low %v1305_v62, %v1305_v62 }
 0x15a   :  { %v1159_v5 = vadd.f32 %v1149_v19, %v1139_v22  ;;  %1428 = vmatpush1.bf16.msra.mxu0 %v2391_v3  ;;  %v3980_v0 = vld [vmem:[#allocation4_spill] sm:$0xff]  ;;  %v3981_v40 = vld [vmem:[#allocation5_spill] sm:$0xff]  ;;  %v3983_v31 = vld [vmem:[#allocation7_spill] sm:$0xff] }
 0x15b   :  { %1429 = vmatprep.subr.bf16.mxu0 %v2392_v15  ;;  %v3984_v18 = vld [vmem:[#allocation8_spill] sm:$0xff]  ;;  %v3985_v46 = vld [vmem:[#allocation9_spill] sm:$0xff]  ;;  %v3986_v20 = vld [vmem:[#allocation10_spill] sm:$0xff] }
 0x15c   :  { %1244 = vmatprep.mubr.f32.mxu0 %v1159_v5  ;;  %v3987_v48 = vld [vmem:[#allocation11_spill] sm:$0xff]  ;;  %v3988_v25 = vld [vmem:[#allocation12_spill] sm:$0xff]  ;;  %v3989_v29 = vld [vmem:[#allocation14_spill] sm:$0xff] }
 0x15d   :  { %1245 = vmatmul.mubr.f32.gmra.mxu0 %v1158_v59  ;;  %v3990_v22 = vld [vmem:[#allocation16_spill] sm:$0xff]  ;;  %v3991_v19 = vld [vmem:[#allocation18_spill] sm:$0xff] }
 0x15e   :  { %1430 = vmatpush1.bf16.msra.mxu0 %v2393_v11  ;;  %1453 = vmatprep.mubr.bf16.mxu0 %v3573_v24  ;;  %v3992_v63 = vld [vmem:[#allocation20_spill] sm:$0xff]  ;;  %v3993_v7 = vld [vmem:[#allocation22_spill] sm:$0xff] }
 0x15f   :  { %1431 = vmatprep.subr.bf16.mxu0 %v2394_v45  ;;  %v3994_v9 = vld [vmem:[#allocation24_spill] sm:$0xff]  ;;  %v3995_v5 = vld [vmem:[#allocation26_spill] sm:$0xff] }
 0x160   :  { %v3996_v3 = vld [vmem:[#allocation28_spill] sm:$0xff]  ;;  %v3999_v15 = vld [vmem:[#allocation34_spill] sm:$0xff] }
 0x161   :  { %v3998_v59 = vld [vmem:[#allocation32_spill] sm:$0xff]  ;;  %v4001_v45 = vld [vmem:[#allocation38_spill] sm:$0xff] }
 0x162   :  { %1432 = vmatpush1.bf16.msra.mxu0 %v2395_v26  ;;  %v4000_v11 = vld [vmem:[#allocation36_spill] sm:$0xff]  ;;  %v4002_v26 = vld [vmem:[#allocation39_spill] sm:$0xff] }
 0x163   :  { %1433 = vmatprep.subr.bf16.mxu0 %v2396_v28  ;;  %v4003_v28 = vld [vmem:[#allocation40_spill] sm:$0xff] }
 0x166   :  { %1434 = vmatpush1.bf16.msra.mxu0 %v2397_v30 }
 0x167   :  { %1435 = vmatprep.subr.bf16.mxu0 %v2398_v53 }
 0x16a   :  { %1436 = vmatpush1.bf16.msra.mxu0 %v2399_v4 }
 0x16b   :  { %1437 = vmatprep.subr.bf16.mxu0 %v2400_v43 }
 0x16e   :  { %1438 = vmatpush2.bf16.msra.mxu0 %v2401_v39 }
 0x16f   :  { %1439 = vmatprep.subr.bf16.mxu0 %v2402_v23 }
 0x172   :  { %1440 = vmatpush2.bf16.msra.mxu0 %v2403_v6 }
 0x173   :  { %1441 = vmatprep.subr.bf16.mxu0 %v2404_v8 }
 0x176   :  { %1442 = vmatpush2.bf16.msra.mxu0 %v2405_v51 }
 0x177   :  { %1443 = vmatprep.subr.bf16.mxu0 %v2406_v54 }
 0x17a   :  { %1444 = vmatpush2.bf16.msra.mxu0 %v2407_v10 }
 0x17b   :  { %1445 = vmatprep.subr.bf16.mxu0 %v2408_v33 }
 0x17e   :  { %1446 = vmatpush2.bf16.msra.mxu0 %v2409_v37 }
 0x17f   :  { %1447 = vmatprep.subr.bf16.mxu0 %v2410_v55 }
 0x182   :  { %1448 = vmatpush2.bf16.msra.mxu0 %v2411_v12 }
 0x183   :  { %1449 = vmatprep.subr.bf16.mxu0 %v2412_v52  ;;  %v1394_v50 = vpop.f32.mrf.mxu1 }
 0x185   :  { %v1396_v30 = vpop.f32.mrf.mxu1 }
 0x186   :  { %1450 = vmatpush2.bf16.msra.mxu0 %v2413_v21 }
 0x187   :  { %1451 = vmatprep.subr.bf16.mxu0 %v2414_v61  ;;  %v1398_v32 = vpop.f32.mrf.mxu1 }
 0x189   :  { %v1400_v53 = vpop.f32.mrf.mxu1 }
 0x18a   :  { %1452 = vmatpush2.bf16.msra.mxu0 %v2415_v1 }
 0x18b   :  { %1543 = vmatprep.subr.bf16.mxu0 %v2416_v42 }
 0x18d   :  { %1454 = vmatmul.mubr.bf16.vlgmr.msra.gmra.mxu0 %v2331_v35 }
 0x18e   :  { %1544 = vmatpush1.bf16.msra.mxu0 %v2417_v57  ;;  %1463 = vmatprep.mubr.bf16.mxu0 %v2336_v14 }
 0x18f   :  { %1545 = vmatprep.subr.bf16.mxu0 %v2418_v60 }
 0x192   :  { %1546 = vmatpush1.bf16.msra.mxu0 %v2419_v13 }
 0x193   :  { %1547 = vmatprep.subr.bf16.mxu0 %v2420_v41 }
 0x195   :  { %1464 = vmatmul.mubr.bf16.gmra.mxu0 %v2339_v56 }
 0x196   :  { %1548 = vmatpush1.bf16.msra.mxu0 %v2421_v58  ;;  %1473 = vmatprep.mubr.bf16.mxu0 %v2020_v17 }
 0x197   :  { %1549 = vmatprep.subr.bf16.mxu0 %v3979_v16 }
 0x19a   :  { %1550 = vmatpush1.bf16.msra.mxu0 %v3980_v0 }
 0x19b   :  { %1551 = vmatprep.subr.bf16.mxu0 %v3981_v40 }
 0x19d   :  { %1474 = vmatmul.mubr.bf16.gmra.mxu0 %v2019_v49 }
 0x19e   :  { %1552 = vmatpush1.bf16.msra.mxu0 %v3982_v27  ;;  %1575 = vmatprep.mubr.bf16.mxu0 %v3573_v24  ;;  %v3997_v24 = vld [vmem:[#allocation30_spill] sm:$0xff] }
 0x19f   :  { %1553 = vmatprep.subr.bf16.mxu0 %v3983_v31 }
 0x1a1   :  { %v3722_v2 = vpop.f32.mrf.mxu1 }
 0x1a2   :  { %1554 = vmatpush1.bf16.msra.mxu0 %v3984_v18 }
 0x1a3   :  { %1555 = vmatprep.subr.bf16.mxu0 %v3985_v46  ;;  %v3724_v36 = vpop.f32.mrf.mxu1 }
 0x1a5   :  { %v3726_v34 = vpop.f32.mrf.mxu1 }
 0x1a6   :  { %1556 = vmatpush1.bf16.msra.mxu0 %v3986_v20 }
 0x1a7   :  { %1557 = vmatprep.subr.bf16.mxu0 %v3987_v48  ;;  %v3728_v4 = vpop.f32.mrf.mxu1 }
 0x1aa   :  { %1558 = vmatpush1.bf16.msra.mxu0 %v3988_v25  ;;  %v3730_v38 = vpop.f32.mrf.mxu1 }
 0x1ab   :  { %1559 = vmatprep.subr.bf16.mxu0 %v3989_v29 }
 0x1ac   :  { %v3732_v43 = vpop.f32.mrf.mxu1 }
 0x1ae   :  { %1560 = vmatpush2.bf16.msra.mxu0 %v3990_v22  ;;  %v1418_v44 = vpop.f32.mrf.mxu1 }
 0x1af   :  { %1561 = vmatprep.subr.bf16.mxu0 %v3991_v19 }
 0x1b0   :  { %v1419_v39 = vpop.f32.mrf.mxu1 }
 0x1b2   :  { %1562 = vmatpush2.bf16.msra.mxu0 %v3992_v63 }
 0x1b3   :  { %1563 = vmatprep.subr.bf16.mxu0 %v3993_v7 }
 0x1b6   :  { %1564 = vmatpush2.bf16.msra.mxu0 %v3994_v9 }
 0x1b7   :  { %1565 = vmatprep.subr.bf16.mxu0 %v3995_v5 }
 0x1ba   :  { %1566 = vmatpush2.bf16.msra.mxu0 %v3996_v3 }
 0x1bb   :  { %1567 = vmatprep.subr.bf16.mxu0 %v3997_v24 }
 0x1be   :  { %1568 = vmatpush2.bf16.msra.mxu0 %v3998_v59 }
 0x1bf   :  { %1569 = vmatprep.subr.bf16.mxu0 %v3999_v15 }
 0x1c2   :  { %1570 = vmatpush2.bf16.msra.mxu0 %v4000_v11 }
 0x1c3   :  { %1571 = vmatprep.subr.bf16.mxu0 %v4001_v45 }
 0x1c6   :  { %1572 = vmatpush2.bf16.msra.mxu0 %v4002_v26 }
 0x1c7   :  { %1573 = vmatprep.subr.bf16.mxu0 %v4003_v28 }
 0x1ca   :  { %1574 = vmatpush2.bf16.msra.mxu0 %v4004_v47 }
 0x1cd   :  { %1576 = vmatmul.mubr.bf16.vlgmr.msra.gmra.mxu0 %v2331_v35 }
 0x1ce   :  { %1585 = vmatprep.mubr.bf16.mxu0 %v2336_v14 }
 0x1d5   :  { %1586 = vmatmul.mubr.bf16.gmra.mxu0 %v2339_v56 }
 0x1d6   :  { %1595 = vmatprep.mubr.bf16.mxu0 %v2020_v17 }
 0x1dd   :  { %1596 = vmatmul.mubr.bf16.gmra.mxu0 %v2019_v49 }
 0x1f2   :  { %v1516_v23 = vpop.f32.mrf.mxu1 }
 0x1f4   :  { %v1518_v6 = vpop.f32.mrf.mxu1 }
 0x1f6   :  { %v1520_v8 = vpop.f32.mrf.mxu1 }
 0x1f8   :  { %v1522_v54 = vpop.f32.mrf.mxu1 }
 0x1fa   :  { %v1526_v37 = vpop.f32.mrf.mxu1 }
 0x1fc   :  { %v1528_v12 = vpop.f32.mrf.mxu1 }
 0x1fe   :  { %v3736_v21 = vpop.f32.mrf.mxu1 }
 0x200   :  { %v3740_v1 = vpop.f32.mrf.mxu1 }
 0x202   :  { %v3744_v57 = vpop.f32.mrf.mxu1 }
 0x204   :  { %v3746_v62 = vpop.f32.mrf.mxu1 }
 0x206   :  { %v1540_v13 = vpop.f32.mrf.mxu1 }
 0x208   :  { %v1541_v58 = vpop.f32.mrf.mxu1 }
 0x20d   :  { %v2058_v51 = vpop.f32.mrf.mxu0 }
 0x20f   :  { %v2059_v10 = vpop.f32.mrf.mxu0 }
 0x210   :  { %v3734_v33 = vadd.f32 %v2059_v10, %v2058_v51 }
 0x211   :  { %v2061_v55 = vpop.f32.mrf.mxu0 }
 0x213   :  { %v2062_v52 = vpop.f32.mrf.mxu0 }
 0x214   :  { %v3738_v61 = vadd.f32 %v2062_v52, %v2061_v55 }
 0x215   :  { %v2064_v35 = vpop.f32.mrf.mxu0 }
 0x217   :  { %v2065_v14 = vpop.f32.mrf.mxu0 }
 0x218   :  { %v3742_v42 = vadd.f32 %v2065_v14, %v2064_v35 }
 0x219   :  { %v2067_v60 = vpop.f32.mrf.mxu0 }
 0x21b   :  { %v2068_v56 = vpop.f32.mrf.mxu0 }
 0x21c   :  { %v3748_v17 = vadd.f32 %v2068_v56, %v2067_v60 }
 0x21d   :  { %v2070_v41 = vpop.f32.mrf.mxu0 }
 0x21f   :  { %v2071_v16 = vpop.f32.mrf.mxu0 }
 0x220   :  { %v3750_v49 = vadd.f32 %v2071_v16, %v2070_v41 }
 0x24d   :  { %v1455_v0 = vpop.f32.mrf.mxu0 }
 0x24e   :  { %v1456_v5 = vadd.f32 %v1455_v0, %v1394_v50 }
 0x24f   :  { %v1457_v40 = vpop.f32.mrf.mxu0 }
 0x250   :  { %v1458_v7 = vadd.f32 %v1457_v40, %v1396_v30  ;;  %v1604_v47 = vmul.f32 %v1456_v5, %v1456_v5 }
 0x251   :  { %v1459_v27 = vpop.f32.mrf.mxu0 }
 0x252   :  { %v1605_v11 = vmul.f32 %v1458_v7, %v1458_v7  ;;  %v1460_v44 = vadd.f32 %v1459_v27, %v1398_v32 }
 0x253   :  { %v1461_v31 = vpop.f32.mrf.mxu0 }
 0x254   :  { %v1462_v45 = vadd.f32 %v1461_v31, %v1400_v53 }
 0x255   :  { %v1465_v18 = vpop.f32.mrf.mxu0 }
 0x256   :  { %v1607_v14 = vmul.f32 %v1462_v45, %v1462_v45  ;;  %v1466_v60 = vadd.f32 %v1465_v18, %v3722_v2 }
 0x257   :  { %v1467_v46 = vpop.f32.mrf.mxu0 }
 0x258   :  { %v1468_v30 = vadd.f32 %v1467_v46, %v3724_v36  ;;  %v1608_v36 = vmul.f32 %v1466_v60, %v1466_v60 }
 0x259   :  { %v1469_v20 = vpop.f32.mrf.mxu0 }
 0x25b   :  { %v1471_v48 = vpop.f32.mrf.mxu0 }
 0x25c   :  { %v1472_v58 = vadd.f32 %v1471_v48, %v3728_v4 }
 0x25d   :  { %v1475_v25 = vpop.f32.mrf.mxu0 }
 0x25e   :  { %v1611_v46 = vmul.f32 %v1472_v58, %v1472_v58  ;;  %v1476_v48 = vadd.f32 %v1475_v25, %v3730_v38  ;;  %v1250_v38 = vmax.f32 %v3734_v33, 0.0  ;;  %v1251_v25 = vmax.f32 %v3738_v61, 0.0 }
 0x25f   :  { %v1477_v29 = vpop.f32.mrf.mxu0 }
 0x260   :  { %2344 = vrsqrt.f32 %v1250_v38  ;;  %vm1257_vm0 = vcmp.eq.f32.partialorder %v1250_v38, inf  ;;  %vm1259_vm1 = vcmp.eq.f32.partialorder %v1250_v38, 0.0  ;;  %vm1264_vm2 = vcmp.eq.f32.partialorder %v1251_v25, inf }
 0x261   :  { %v1479_v22 = vpop.f32.mrf.mxu0  ;;  %2346 = vrsqrt.f32 %v1251_v25  ;;  %vm1266_vm4 = vcmp.eq.f32.partialorder %v1251_v25, 0.0 }
 0x262   :  { %v1478_v22 = vadd.f32 %v1477_v29, %v3732_v43 }
 0x263   :  { %v1480_v19 = vpop.f32.mrf.mxu0 }
 0x264   :  { %v1613_v5 = vmul.f32 %v1478_v22, %v1478_v22 }
 0x28d   :  { %v1577_v63 = vpop.f32.mrf.mxu0 }
 0x28e   :  { %v1578_v9 = vadd.f32 %v1577_v63, %v1516_v23 }
 0x28f   :  { %v1579_v3 = vpop.f32.mrf.mxu0 }
 0x290   :  { %v1580_v24 = vadd.f32 %v1579_v3, %v1518_v6  ;;  %v1614_v59 = vmul.f32 %v1578_v9, %v1578_v9  ;;  %v1606_v6 = vmul.f32 %v1460_v44, %v1460_v44 }
 0x291   :  { %v1581_v15 = vpop.f32.mrf.mxu0 }
 0x292   :  { %v1615_v26 = vmul.f32 %v1580_v24, %v1580_v24  ;;  %v1582_v28 = vadd.f32 %v1581_v15, %v1520_v8  ;;  %v1624_v55 = vadd.f32 %v1614_v59, %v1604_v47  ;;  %v1612_v24 = vmul.f32 %v1476_v48, %v1476_v48 }
 0x293   :  { %v1583_v39 = vpop.f32.mrf.mxu0  ;;  %v3766_v59 = vmax.f32 %v3748_v17, 0.0  ;;  %v3769_v15 = vmax.f32 %v3750_v49, 0.0  ;;  %v1260_v17 = vand.u32 2147483648, %v1250_v38 }
 0x294   :  { %v1625_v51 = vadd.f32 %v1615_v26, %v1605_v11  ;;  %v1584_v10 = vadd.f32 %v1583_v39, %v1522_v54  ;;  %v1616_v52 = vmul.f32 %v1582_v28, %v1582_v28  ;;  %v1609_v54 = vmul.f32 %v1468_v30, %v1468_v30  ;;  %v2345_v11 = vpop.eup %2344 }
 0x295   :  { %v1587_v35 = vpop.f32.mrf.mxu0  ;;  %v1256_v33 = vmul.f32 %v2345_v11, %v1250_v38  ;;  %v2347_v28 = vpop.eup %2346  ;;  %vm1278_vm6 = vcmp.eq.f32.partialorder %v3766_v59, inf  ;;  %vm1285_vm7 = vcmp.eq.f32.partialorder %v3769_v15, inf  ;;  %vm1280_vm8 = vcmp.eq.f32.partialorder %v3766_v59, 0.0 }
 0x296   :  { %v1617_v50 = vmul.f32 %v1584_v10, %v1584_v10  ;;  %v1588_v23 = vadd.f32 %v1587_v35, %v1526_v37  ;;  %1698 = vmatprep.mubr.f32.mxu1 %v1625_v51  ;;  %v1626_v32 = vadd.f32 %v1616_v52, %v1606_v6  ;;  %v1470_v37 = vadd.f32 %v1469_v20, %v3726_v34 }
 0x297   :  { %v1589_v53 = vpop.f32.mrf.mxu0  ;;  %1699 = vmatmul.mubr.f32.vlgmr.msra.gmra.mxu1 %v1624_v55  ;;  %v1258_v44 = vsel %vm1257_vm0, %v1250_v38, %v1256_v33  ;;  %v1263_v51 = vmul.f32 %v2347_v28, %v1251_v25  ;;  %v3779_v55 = vstv %s3862_s0  ;;  %vm1287_vm9 = vcmp.eq.f32.partialorder %v3769_v15, 0.0 }
 0x298   :  { %v1627_v8 = vadd.f32 %v1617_v50, %v1607_v14  ;;  %v1590_v56 = vadd.f32 %v1589_v53, %v1528_v12  ;;  %v1618_v13 = vmul.f32 %v1588_v23, %v1588_v23  ;;  %v1261_v10 = vsel %vm1259_vm1, %v1260_v17, %v1258_v44 }
 0x299   :  { %v1591_v41 = vpop.f32.mrf.mxu0  ;;  %v1265_v30 = vsel %vm1264_vm2, %v1251_v25, %v1263_v51  ;;  %v3784_v60 = vmul.f32 %v3779_v55, %v1261_v10  ;;  %v1267_v53 = vand.u32 2147483648, %v1251_v25 }
 0x29a   :  { %v1619_v16 = vmul.f32 %v1590_v56, %v1590_v56  ;;  %v1592_v0 = vadd.f32 %v1591_v41, %v3736_v21  ;;  %1703 = vmatprep.mubr.f32.mxu1 %v1627_v8  ;;  %v1628_v31 = vadd.f32 %v1618_v13, %v1608_v36  ;;  %v1610_v21 = vmul.f32 %v1470_v37, %v1470_v37 }
 0x29b   :  { %v1593_v40 = vpop.f32.mrf.mxu0  ;;  %1704 = vmatmul.mubr.f32.gmra.mxu1 %v1626_v32  ;;  %v1268_v41 = vsel %vm1266_vm4, %v1267_v53, %v1265_v30  ;;  %v1784_v36 = vmax.f32 %v3784_v60, 0.056234132 }
 0x29c   :  { %v1629_v2 = vadd.f32 %v1619_v16, %v1609_v54  ;;  %v1594_v27 = vadd.f32 %v1593_v40, %v3740_v1  ;;  %v1620_v12 = vmul.f32 %v1592_v0, %v1592_v0  ;;  %v3793_v40 = vmul.f32 %v3779_v55, %v1268_v41 }
 0x29d   :  { %v1597_v18 = vpop.f32.mrf.mxu0 }
 0x29e   :  { %v1621_v19 = vmul.f32 %v1594_v27, %v1594_v27  ;;  %v1598_v4 = vadd.f32 %v1597_v18, %v3744_v57  ;;  %1708 = vmatprep.mubr.f32.mxu1 %v1629_v2  ;;  %v1630_v7 = vadd.f32 %v1620_v12, %v1610_v21  ;;  %v1785_v48 = vmax.f32 %v3793_v40, 0.056234132 }
 0x29f   :  { %v1599_v63 = vpop.f32.mrf.mxu0  ;;  %1709 = vmatmul.mubr.f32.gmra.mxu1 %v1628_v31 }
 0x2a0   :  { %v1631_v34 = vadd.f32 %v1621_v19, %v1611_v46  ;;  %v1600_v20 = vadd.f32 %v1599_v63, %v3746_v62  ;;  %v1622_v1 = vmul.f32 %v1598_v4, %v1598_v4  ;;  %v1252_v62 = vmax.f32 %v3742_v42, 0.0 }
 0x2a1   :  { %v1601_v9 = vpop.f32.mrf.mxu0  ;;  %v1281_v19 = vand.u32 2147483648, %v3766_v59 }
 0x2a2   :  { %v1623_v3 = vmul.f32 %v1600_v20, %v1600_v20  ;;  %1713 = vmatprep.mubr.f32.mxu1 %v1631_v34  ;;  %v1632_v57 = vadd.f32 %v1622_v1, %v1612_v24  ;;  %2348 = vrsqrt.f32 %v1252_v62  ;;  %vm1271_vm3 = vcmp.eq.f32.partialorder %v1252_v62, inf }
 0x2a3   :  { %v1602_v43 = vpop.f32.mrf.mxu0  ;;  %1714 = vmatmul.mubr.f32.gmra.mxu1 %v1630_v7  ;;  %2350 = vrsqrt.f32 %v3766_v59  ;;  %v1274_v54 = vand.u32 2147483648, %v1252_v62  ;;  %vm1273_vm5 = vcmp.eq.f32.partialorder %v1252_v62, 0.0  ;;  %v1288_v20 = vand.u32 2147483648, %v3769_v15 }
 0x2a4   :  { %v1633_v29 = vadd.f32 %v1623_v3, %v1613_v5  ;;  %2352 = vrsqrt.f32 %v3769_v15 }
 0x2a6   :  { %1718 = vmatprep.mubr.f32.mxu1 %v1633_v29 }
 0x2a7   :  { %1719 = vmatmul.mubr.f32.gmra.mxu1 %v1632_v57 }
 0x2af   :  { %v2349_v47 = vpop.eup %2348 }
 0x2b0   :  { %v1270_v52 = vmul.f32 %v2349_v47, %v1252_v62  ;;  %v2351_v6 = vpop.eup %2350 }
 0x2b1   :  { %v2353_v13 = vpop.eup %2352  ;;  %v1277_v16 = vmul.f32 %v2351_v6, %v3766_v59 }
 0x2b2   :  { %v1272_v56 = vsel %vm1271_vm3, %v1252_v62, %v1270_v52  ;;  %v1284_v2 = vmul.f32 %v2353_v13, %v3769_v15 }
 0x2b3   :  { %v1275_v37 = vsel %vm1273_vm5, %v1274_v54, %v1272_v56  ;;  %v1279_v18 = vsel %vm1278_vm6, %v3766_v59, %v1277_v16 }
 0x2b4   :  { %v3798_v12 = vmul.f32 %v3779_v55, %v1275_v37  ;;  %v1286_v63 = vsel %vm1285_vm7, %v3769_v15, %v1284_v2  ;;  %v1282_v34 = vsel %vm1280_vm8, %v1281_v19, %v1279_v18 }
 0x2b5   :  { %v1289_v3 = vsel %vm1287_vm9, %v1288_v20, %v1286_v63  ;;  %v1294_v43 = vmul.f32 %v3779_v55, %v1282_v34 }
 0x2b6   :  { %v1786_v9 = vmax.f32 %v3798_v12, 0.056234132  ;;  %v1295_v25 = vmul.f32 %v3779_v55, %v1289_v3 }
 0x357   :  { %v2105_v45 = vpop.f32.mrf.mxu1 }
 0x359   :  { %v2106_v26 = vpop.f32.mrf.mxu1 }
 0x35a   :  { %v2107_v61 = vadd.f32 %v2106_v26, %v2105_v45  ;;  %v1787_v45 = vmax.f32 %v1294_v43, 0.056234132 }
 0x35b   :  { %v2108_v42 = vpop.f32.mrf.mxu1 }
 0x35c   :  { %v3773_v39 = vmax.f32 %v2107_v61, 0.0 }
 0x35d   :  { %v2109_v49 = vpop.f32.mrf.mxu1 }
 0x35e   :  { %2354 = vrsqrt.f32 %v3773_v39  ;;  %v2110_v35 = vadd.f32 %v2109_v49, %v2108_v42  ;;  %vm1731_vm10 = vcmp.eq.f32.partialorder %v3773_v39, inf  ;;  %v1734_v5 = vand.u32 2147483648, %v3773_v39 }
 0x35f   :  { %v2111_v14 = vpop.f32.mrf.mxu1  ;;  %vm1733_vm11 = vcmp.eq.f32.partialorder %v3773_v39, 0.0  ;;  %v1788_v42 = vmax.f32 %v1295_v25, 0.056234132 }
 0x360   :  { %v3781_v50 = vmax.f32 %v2110_v35, 0.0 }
 0x361   :  { %v2112_v23 = vpop.f32.mrf.mxu1 }
 0x362   :  { %v2113_v8 = vadd.f32 %v2112_v23, %v2111_v14  ;;  %2356 = vrsqrt.f32 %v3781_v50  ;;  %vm1738_vm12 = vcmp.eq.f32.partialorder %v3781_v50, inf  ;;  %v1741_v15 = vand.u32 2147483648, %v3781_v50 }
 0x363   :  { %v2114_v32 = vpop.f32.mrf.mxu1  ;;  %vm1740_vm13 = vcmp.eq.f32.partialorder %v3781_v50, 0.0 }
 0x364   :  { %v3787_v58 = vmax.f32 %v2113_v8, 0.0 }
 0x365   :  { %v2115_v0 = vpop.f32.mrf.mxu1 }
 0x366   :  { %2358 = vrsqrt.f32 %v3787_v58  ;;  %v2116_v27 = vadd.f32 %v2115_v0, %v2114_v32  ;;  %vm1745_vm14 = vcmp.eq.f32.partialorder %v3787_v58, inf  ;;  %v1748_v44 = vand.u32 2147483648, %v3787_v58 }
 0x367   :  { %v2117_v31 = vpop.f32.mrf.mxu1  ;;  %2360 = vrcp.f32 %v1784_v36  ;;  %vm1747_vm15 = vcmp.eq.f32.partialorder %v3787_v58, 0.0 }
 0x368   :  { %v3801_v46 = vmax.f32 %v2116_v27, 0.0 }
 0x369   :  { %v2118_v22 = vpop.f32.mrf.mxu1 }
 0x36a   :  { %v2119_v4 = vadd.f32 %v2118_v22, %v2117_v31  ;;  %2362 = vrsqrt.f32 %v3801_v46  ;;  %vm1752_vm0 = vcmp.eq.f32.partialorder %v3801_v46, inf  ;;  %v1755_v6 = vand.u32 2147483648, %v3801_v46 }
 0x36b   :  { %v2355_v21 = vpop.eup %2354  ;;  %vm1754_vm1 = vcmp.eq.f32.partialorder %v3801_v46, 0.0 }
 0x36c   :  { %v1730_v7 = vmul.f32 %v2355_v21, %v3773_v39  ;;  %v3811_v1 = vmax.f32 %v2119_v4, 0.0 }
 0x36e   :  { %v1732_v24 = vsel %vm1731_vm10, %v3773_v39, %v1730_v7  ;;  %2364 = vrsqrt.f32 %v3811_v1  ;;  %vm1759_vm2 = vcmp.eq.f32.partialorder %v3811_v1, inf  ;;  %v1762_v16 = vand.u32 2147483648, %v3811_v1 }
 0x36f   :  { %2366 = vrcp.f32 %v1785_v48  ;;  %v1735_v29 = vsel %vm1733_vm11, %v1734_v5, %v1732_v24  ;;  %v2357_v57 = vpop.eup %2356  ;;  %vm1761_vm3 = vcmp.eq.f32.partialorder %v3811_v1, 0.0 }
 0x370   :  { %v1764_v38 = vmul.f32 %v1735_v29, %v3779_v55  ;;  %v1737_v62 = vmul.f32 %v2357_v57, %v3781_v50  ;;  %2368 = vrcp.f32 %v1786_v9 }
 0x371   :  { %2370 = vrcp.f32 %v1787_v45 }
 0x372   :  { %v1769_v59 = vsub.f32 %v3784_v60, %v1764_v38  ;;  %v1739_v33 = vsel %vm1738_vm12, %v3781_v50, %v1737_v62  ;;  %2372 = vrcp.f32 %v1788_v42 }
 0x373   :  { %v2359_v11 = vpop.eup %2358  ;;  %v1742_v28 = vsel %vm1740_vm13, %v1741_v15, %v1739_v33 }
 0x374   :  { %v1774_v26 = vand.u32 2147483647, %v1769_v59  ;;  %v1744_v61 = vmul.f32 %v2359_v11, %v3787_v58  ;;  %v1765_v47 = vmul.f32 %v1742_v28, %v3779_v55  ;;  %v2361_v51 = vpop.eup %2360 }
 0x376   :  { %v1779_v39 = vmax.f32 %v1774_v26, 1e-06  ;;  %v1746_v17 = vsel %vm1745_vm14, %v3787_v58, %v1744_v61  ;;  %v1770_v49 = vsub.f32 %v3793_v40, %v1765_v47 }
 0x377   :  { %v1749_v10 = vsel %vm1747_vm15, %v1748_v44, %v1746_v17  ;;  %v2363_v52 = vpop.eup %2362 }
 0x378   :  { %v1794_v35 = vmul.f32 %v2361_v51, %v1779_v39  ;;  %v1766_v14 = vmul.f32 %v1749_v10, %v3779_v55  ;;  %v1775_v30 = vand.u32 2147483647, %v1770_v49  ;;  %v1751_v50 = vmul.f32 %v2363_v52, %v3801_v46 }
 0x37a   :  { %2374 = vlog2.f32 %v1794_v35  ;;  %v1771_v23 = vsub.f32 %v3798_v12, %v1766_v14  ;;  %v1780_v53 = vmax.f32 %v1775_v30, 1e-06  ;;  %v1753_v8 = vsel %vm1752_vm0, %v3801_v46, %v1751_v50 }
 0x37b   :  { %v2365_v60 = vpop.eup %2364  ;;  %v1756_v13 = vsel %vm1754_vm1, %v1755_v6, %v1753_v8 }
 0x37c   :  { %v2367_v56 = vpop.eup %2366  ;;  %v1776_v32 = vand.u32 2147483647, %v1771_v23  ;;  %v1758_v41 = vmul.f32 %v2365_v60, %v3811_v1  ;;  %v1767_v58 = vmul.f32 %v1756_v13, %v3779_v55 }
 0x37d   :  { %v1795_v54 = vmul.f32 %v2367_v56, %v1780_v53  ;;  %v2369_v37 = vpop.eup %2368 }
 0x37e   :  { %v1781_v0 = vmax.f32 %v1776_v32, 1e-06  ;;  %v1760_v36 = vsel %vm1759_vm2, %v3811_v1, %v1758_v41  ;;  %v1772_v40 = vsub.f32 %v1294_v43, %v1767_v58  ;;  %v2371_v22 = vpop.eup %2370  ;;  %v1830_v1 = vlaneseq }
 0x37f   :  { %2376 = vlog2.f32 %v1795_v54  ;;  %v1763_v2 = vsel %vm1761_vm3, %v1762_v16, %v1760_v36  ;;  %v2373_v21 = vpop.eup %2372 }
 0x380   :  { %v1796_v27 = vmul.f32 %v2369_v37, %v1781_v0  ;;  %v1768_v31 = vmul.f32 %v1763_v2, %v3779_v55  ;;  %v1777_v12 = vand.u32 2147483647, %v1772_v40  ;;  %v1843_v55 = vand.u32 127, %v1830_v1 }
 0x381   :  { %v1831_v62 = vshrl.u32 %v1830_v1, 7 }
 0x382   :  { %2378 = vlog2.f32 %v1796_v27  ;;  %v1773_v18 = vsub.f32 %v1295_v25, %v1768_v31  ;;  %v1782_v46 = vmax.f32 %v1777_v12, 1e-06  ;;  %vm1849_vm4 = vcmp.lt.s32.totalorder %v1843_v55, 80 }
 0x383   :  { %v1835_v42 = vadd.s32 32, %v1831_v62 }
 0x384   :  { %v1778_v19 = vand.u32 2147483647, %v1773_v18  ;;  %v1797_v4 = vmul.f32 %v2371_v22, %v1782_v46 }
 0x385   :  { %vm1848_vm5 = vcmp.lt.s32.totalorder %v1835_v42, 34 }
 0x386   :  { %v1783_v48 = vmax.f32 %v1778_v19, 1e-06  ;;  %2380 = vlog2.f32 %v1797_v4  ;;  %vm1854_vm6 = vmand %vm1848_vm5, %vm1849_vm4 }
 0x387   :  { %v2375_v63 = vpop.eup %2374 }
 0x388   :  { %v1800_v34 = vmul.f32 0.6931472, %v2375_v63  ;;  %v1798_v20 = vmul.f32 %v2373_v21, %v1783_v48 }
 0x38a   :  { %v1809_v7 = vmul.f32 0.4342945, %v1800_v34  ;;  %2382 = vlog2.f32 %v1798_v20 }
 0x38c   :  { %v2377_v9 = vpop.eup %2376  ;;  %v1814_v5 = vmul.f32 20.0, %v1809_v7 }
 0x38d   :  { %v1802_v3 = vmul.f32 0.6931472, %v2377_v9 }
 0x38e   :  { %v2021_v57 = vclamps-f32 %v1814_v5, 25.0 }
 0x38f   :  { %v2379_v24 = vpop.eup %2378  ;;  %v1810_v43 = vmul.f32 0.4342945, %v1802_v3 }
 0x390   :  { %v1804_v29 = vmul.f32 0.6931472, %v2379_v24  ;;  %v1855_v45 = vsel %vm1849_vm4, %v2021_v57, 0.0 }
 0x391   :  { %v1815_v38 = vmul.f32 20.0, %v1810_v43 }
 0x392   :  { %v1811_v25 = vmul.f32 0.4342945, %v1804_v29 }
 0x393   :  { %v2022_v59 = vclamps-f32 %v1815_v38, 25.0  ;;  %v2381_v15 = vpop.eup %2380 }
 0x394   :  { %v1816_v11 = vmul.f32 20.0, %v1811_v25  ;;  %v1806_v26 = vmul.f32 0.6931472, %v2381_v15 }
 0x395   :  { %v1856_v33 = vsel %vm1849_vm4, %v2022_v59, 0.0 }
 0x396   :  { %v1860_v28 = vadd.f32 %v1856_v33, %v1855_v45  ;;  %v2023_v61 = vclamps-f32 %v1816_v11, 25.0  ;;  %v1812_v44 = vmul.f32 0.4342945, %v1806_v26 }
 0x397   :  { %v2383_v47 = vpop.eup %2382 }
 0x398   :  { %v1857_v39 = vsel %vm1849_vm4, %v2023_v61, 0.0  ;;  %v1808_v17 = vmul.f32 0.6931472, %v2383_v47  ;;  %v1817_v49 = vmul.f32 20.0, %v1812_v44 }
 0x399   :  { %v1861_v51 = vadd.f32 %v1860_v28, %v1857_v39 }
 0x39a   :  { %v1813_v10 = vmul.f32 0.4342945, %v1808_v17  ;;  %v2024_v52 = vclamps-f32 %v1817_v49, 25.0 }
 0x39c   :  { %v1818_v35 = vmul.f32 20.0, %v1813_v10  ;;  %v1858_v14 = vsel %vm1849_vm4, %v2024_v52, 0.0 }
 0x39d   :  { %v1862_v30 = vadd.f32 %v1861_v51, %v1858_v14 }
 0x39e   :  { %v2025_v50 = vclamps-f32 %v1818_v35, 25.0 }
 0x3a0   :  { %v1859_v23 = vsel %vm1854_vm6, %v2025_v50, 0.0 }
 0x3a1   :  { %v1863_v6 = vadd.f32 %v1862_v30, %v1859_v23 }
 0x3a3   :  { %1864 = vst [vmem:[%s3863_s5] sm:$0xff] %v1863_v6 }

</bundles_post_ra>
